<compile_context>
chip_gen: v6e
topology: v6e:2x2x1
jax: 0.10.0
libtpu: 0.0.40
codegen_flags: <defaults>
</compile_context>

<pallas_src>
import functools
import math

import jax
import jax.numpy as jnp
from jax import lax
from jax.experimental import pallas as pl
from jax.experimental.pallas import tpu as pltpu

NUM_KERNELS = 6                                   # module default -> 7 branches
NUM_BRANCHES = NUM_KERNELS // 2 * 2 + 1           # 7
PAD = NUM_KERNELS // 2                            # 3 (half width of 7-tap branch)

# Cross-shaped tap offsets (dh, dw): union of all branch supports.
CROSS_TAPS = tuple([(0, dw) for dw in range(-PAD, PAD + 1)] +
                   [(dh, 0) for dh in range(-PAD, PAD + 1) if dh != 0])
NUM_TAPS = len(CROSS_TAPS)                        # 13
TAP_INDEX = {t: i for i, t in enumerate(CROSS_TAPS)}


# --------------------------------------------------------------------------
# Pallas kernel: one (batch, Cout-block) slab per grid step.
# --------------------------------------------------------------------------
def _inception_cross_kernel(x_ref, w_ref, col_ref, b_ref, o_ref, *,
                            width, chunk, n_chunks, fused, mask_output):
    """x_ref  : (1, Cin, (H+2*PAD)*W) whole zero-padded frame of one batch
                element, rows flattened onto the lane axis.
       w_ref  : (Cout_blk, NUM_TAPS*Cin) fused weights       if fused
                (NUM_TAPS, Cout_blk, Cin) per-tap weights    otherwise
                (the 1/7 branch mean already folded in).
       col_ref: (1, H*W) int32 image-column index of every output lane.
       b_ref  : (Cout_blk, 1) f32 summed bias / 7.
       o_ref  : (1, Cout_blk, H*W) lane-dense output slab."""
    bias_col = b_ref[...]                                   # (Cout_blk, 1) f32

    # Static (unrolled) loop over 128-aligned lane chunks keeps the live f32
    # accumulator small so it never spills; all slice starts are static.
    for c in range(n_chunks):
        base = c * chunk
        col = col_ref[:, base:base + chunk]                 # (1, chunk) int32

        def valid(dw, _col=col):
            # Row taps (0, dw) wrap into the neighbouring image row of the
            # flattened frame at the left/right border; those lanes are zeroed.
            return (_col + dw >= 0) & (_col + dw < width)

        if fused:
            # im2col: 13 shifted (static lane-offset) views stacked along
            # sublanes -> ONE wide-K (13*Cin) matmul on the MXU.
            parts = []
            for (dh, dw) in CROSS_TAPS:
                off = (PAD + dh) * width + dw
                patch = x_ref[0, :, base + off:base + off + chunk]
                if dw != 0:
                    patch = jnp.where(valid(dw), patch, 0)
                parts.append(patch)
            im2col = jnp.concatenate(parts, axis=0)         # (13*Cin, chunk)
            acc = jnp.dot(w_ref[...], im2col,
                          preferred_element_type=jnp.float32) + bias_col
        else:
            # Per-tap dots (best when Cin is tiny/unaligned, or on v5e whose
            # MXU is only 128 deep).  The wrap mask is applied on whichever
            # side has fewer channels.
            acc = None
            for idx, (dh, dw) in enumerate(CROSS_TAPS):
                off = (PAD + dh) * width + dw
                patch = x_ref[0, :, base + off:base + off + chunk]
                if dw != 0 and not mask_output:
                    patch = jnp.where(valid(dw), patch, 0)
                contrib = jnp.dot(w_ref[idx], patch,
                                  preferred_element_type=jnp.float32)
                if dw != 0 and mask_output:
                    contrib = jnp.where(valid(dw), contrib, 0.0)
                # Bias folded into the first tap -> no separate bias pass.
                acc = contrib + bias_col if acc is None else acc + contrib

        o_ref[0, :, base:base + chunk] = acc.astype(o_ref.dtype)


# --------------------------------------------------------------------------
# Wrapper
# --------------------------------------------------------------------------
def _round_up(x, m):
    return (x + m - 1) // m * m


def _padded_block_bytes(rows, cols, dtype):
    """VMEM bytes of a (rows, cols) block after (8, 128) tile padding."""
    return _round_up(rows, 8) * _round_up(cols, 128) * jnp.dtype(dtype).itemsize


def _pick_chunk_rows(H, W, cout_blk, max_chunk_lanes):
    """Largest divisor of H whose flattened lane count is 128-aligned and keeps
    the per-chunk f32 accumulator (cout_blk x chunk) register-resident."""
    cap = min(max_chunk_lanes, max(128, (24 * 1024) // max(cout_blk, 1)))
    best = None
    for r in range(1, H + 1):
        if H % r == 0 and (r * W) % 128 == 0 and r * W <= cap:
            best = r
    if best is None:
        best = H          # no lane-aligned divisor: one chunk (masked stores)
    return best


def inception_block_v2(x, w_packed, bias_packed, *,
                       compute_dtype=None, out_dtype=None,
                       cout_blocks=None, fuse_taps=None,
                       max_chunk_lanes=2048):
    """x: [B, Cin, H, W] (NCHW, as in the PyTorch module).
       w_packed: [NUM_TAPS, Cout, Cin], bias_packed: [Cout] (mean folded in).
       Returns [B, Cout, H, W]."""
    B, Cin, H, W = map(int, x.shape)
    Cout = int(w_packed.shape[1])
    HW = H * W
    PFW = (H + 2 * PAD) * W

    if compute_dtype is None:
        # bf16 halves input DMA bytes on every generation (v5e's MXU takes bf16
        # natively; accumulation stays f32); opt in explicitly (rounds inputs).
        compute_dtype = x.dtype
    if out_dtype is None:
        out_dtype = x.dtype

    if cout_blocks is None:
        # v7x shards "parallel" grid axes over 2 TensorCores: make sure a
        # single-batch call still exposes >= 2 parallel blocks.
        cout_blocks = 2 if (B == 1 and Cout % 16 == 0) else 1
    assert Cout % cout_blocks == 0, "cout_blocks must divide Cout"
    cout_blk = Cout // cout_blocks
    assert cout_blk == Cout or cout_blk % 8 == 0, "Cout block must be 8-aligned"

    if fuse_taps is None:
        # Wide-K (13*Cin) matmul needs sublane-aligned Cin for the in-kernel
        # concat; most useful on the 256-deep v6e/v7x MXU.
        fuse_taps = (Cin % 8 == 0)

    chunk_rows = _pick_chunk_rows(H, W, cout_blk, max_chunk_lanes)
    chunk = chunk_rows * W
    n_chunks = H // chunk_rows

    # --- parameter / input staging (layout plumbing only) ------------------
    wc = w_packed.astype(compute_dtype)
    if fuse_taps:
        # concat order in the kernel is tap-major, cin-minor.
        wc = jnp.transpose(wc, (1, 0, 2)).reshape(Cout, NUM_TAPS * Cin)
    bias2d = bias_packed.reshape(Cout, 1).astype(jnp.float32)
    col_ids = (jnp.arange(HW, dtype=jnp.int32) % W).reshape(1, HW)

    # Single zero-pad along H (handles column taps at the top/bottom border);
    # the flatten to (B, Cin, (H+2*PAD)*W) is a free metadata reshape.  This
    # replaces the old per-tile halo restaging (stack/reshape/pad of x_tiles)
    # that cost an extra full HBM read+write of the activation.
    xp = jnp.pad(x.astype(compute_dtype), ((0, 0), (0, 0), (PAD, PAD), (0, 0)))
    x_flat = xp.reshape(B, Cin, PFW)

    # --- generation-aware VMEM budget ---------------------------------------
    try:
        vmem_phys = int(pltpu.get_tpu_info().vmem_capacity_bytes)
    except Exception:
        vmem_phys = 64 * 2 ** 20            # conservative: smallest (v7x) VMEM
    vmem_cap = (vmem_phys * 3) // 4         # headroom for Mosaic scratch

    if fuse_taps:
        w_block_bytes = _padded_block_bytes(cout_blk, NUM_TAPS * Cin, compute_dtype)
    else:
        w_block_bytes = NUM_TAPS * _padded_block_bytes(cout_blk, Cin, compute_dtype)
    need = 2 * (_padded_block_bytes(Cin, PFW, compute_dtype)      # input frame
                + _padded_block_bytes(cout_blk, HW, out_dtype)    # output block
                + w_block_bytes
                + _padded_block_bytes(1, HW, jnp.int32)           # column ids
                + _padded_block_bytes(cout_blk, 1, jnp.float32))  # bias
    if need > vmem_cap:
        # TODO(synk): add a row-band path (element-indexed halo windows) for
        # frames whose whole padded image does not fit in VMEM.
        raise ValueError(
            f"Inception_Block_V2 Pallas kernel: padded frame needs ~{need >> 20} "
            f"MiB of VMEM but only ~{vmem_cap >> 20} MiB is available.")
    vmem_limit = int(min(vmem_cap, max(2 * need, 16 * 2 ** 20)))

    if fuse_taps:
        w_spec = pl.BlockSpec((cout_blk, NUM_TAPS * Cin), lambda b, j: (j, 0))
    else:
        w_spec = pl.BlockSpec((NUM_TAPS, cout_blk, Cin), lambda b, j: (0, j, 0))

    kernel = functools.partial(_inception_cross_kernel,
                               width=W, chunk=chunk, n_chunks=n_chunks,
                               fused=fuse_taps,
                               mask_output=(cout_blk < Cin))

    out_flat = pl.pallas_call(
        kernel,
        out_shape=jax.ShapeDtypeStruct((B, Cout, HW), out_dtype),
        grid=(B, cout_blocks),
        in_specs=[
            pl.BlockSpec((1, Cin, PFW), lambda b, j: (b, 0, 0)),
            w_spec,
            pl.BlockSpec((1, HW), lambda b, j: (0, 0)),
            pl.BlockSpec((cout_blk, 1), lambda b, j: (j, 0)),
        ],
        out_specs=pl.BlockSpec((1, cout_blk, HW), lambda b, j: (b, j, 0)),
        compiler_params=pltpu.CompilerParams(
            dimension_semantics=("parallel", "parallel"),
            vmem_limit_bytes=vmem_limit),
    )(x_flat, wc, col_ids, bias2d)

    return out_flat.reshape(B, Cout, H, W)        # free metadata reshape


# --------------------------------------------------------------------------
# Parameters (PyTorch-style init), packing, and pure-JAX reference
# --------------------------------------------------------------------------
def make_branch_params(key, cin, cout):
    """Per-branch Conv2d weights (OIHW) / biases, PyTorch default uniform init."""
    shapes = []
    for i in range(NUM_KERNELS // 2):
        shapes.append((1, 2 * i + 3))             # 1 x (2i+3), padding (0, i+1)
        shapes.append((2 * i + 3, 1))             # (2i+3) x 1, padding (i+1, 0)
    shapes.append((1, 1))                         # 1x1
    keys = jax.random.split(key, 2 * len(shapes))
    weights, biases = [], []
    for ci, (kh, kw) in enumerate(shapes):
        bound = 1.0 / math.sqrt(cin * kh * kw)
        weights.append(jax.random.uniform(keys[2 * ci], (cout, cin, kh, kw),
                                          jnp.float32, -bound, bound))
        biases.append(jax.random.uniform(keys[2 * ci + 1], (cout,),
                                         jnp.float32, -bound, bound))
    return weights, biases


def pack_cross_params(weights, biases):
    """Collapse the 7 branches into 13 cross taps and fold in the 1/7 mean."""
    cout, cin = weights[0].shape[0], weights[0].shape[1]
    w_packed = jnp.zeros((NUM_TAPS, cout, cin), jnp.float32)
    for w in weights:
        kh, kw = w.shape[2], w.shape[3]
        for a in range(kh):
            for b in range(kw):
                tap = TAP_INDEX[(a - kh // 2, b - kw // 2)]
                w_packed = w_packed.at[tap].add(w[:, :, a, b])
    scale = 1.0 / NUM_BRANCHES
    return w_packed * scale, sum(biases) * scale


def reference(x, weights, biases):
    """Pure-JAX replica of Inception_Block_V2.forward (NCHW)."""
    outs = []
    for w, b in zip(weights, biases):
        kh, kw = w.shape[2], w.shape[3]
        o = lax.conv_general_dilated(
            x, w, window_strides=(1, 1),
            padding=((kh // 2, kh // 2), (kw // 2, kw // 2)),
            dimension_numbers=("NCHW", "OIHW", "NCHW"),
            precision=lax.Precision.HIGHEST)
        outs.append(o + b[None, :, None, None])
    return jnp.mean(jnp.stack(outs, axis=-1), axis=-1)


if __name__ == "__main__":
    key = jax.random.PRNGKey(0)
    configs = [
        # (B, Cin, Cout, H, W, max_chunk_lanes)
        (2, 4, 8, 16, 16, 128),    # required small shape: per-tap path, 2 chunks
        (1, 8, 16, 8, 32, 2048),   # fused wide-K path; B=1 -> Cout split (2 blocks)
    ]
    for i, (B, CIN, COUT, H, W, mcl) in enumerate(configs):
        kx, kp, key = jax.random.split(key, 3)
        x = jax.random.normal(kx, (B, CIN, H, W), dtype=jnp.float32)  # NCHW

        conv_ws, conv_bs = make_branch_params(kp, CIN, COUT)
        w_packed, bias_packed = pack_cross_params(conv_ws, conv_bs)

        out = inception_block_v2(x, w_packed, bias_packed, max_chunk_lanes=mcl)
        out = jax.block_until_ready(out)

        ref = jax.block_until_ready(reference(x, conv_ws, conv_bs))
        assert out.shape == (B, COUT, H, W)
        err = float(jnp.max(jnp.abs(out - ref)))
        assert jnp.allclose(out, ref, rtol=1e-4, atol=1e-4), \
            f"config {i} mismatch: max abs err = {err}"

    print("KERNEL_OK")
</pallas_src>

<mosaic_0001>
module attributes {stable_mosaic.version = 11 : i64} {
  func.func @_inception_cross_kernel(%arg0: i32, %arg1: i32, %arg2: memref<1x4x352xf32, #tpu.memory_space<vmem>>, %arg3: memref<13x8x4xf32, #tpu.memory_space<vmem>>, %arg4: memref<1x256xi32, #tpu.memory_space<vmem>>, %arg5: memref<8x1xf32, #tpu.memory_space<vmem>>, %arg6: memref<1x8x256xf32, #tpu.memory_space<vmem>>) attributes {dimension_semantics = [#tpu.dimension_semantics<parallel>, #tpu.dimension_semantics<parallel>], iteration_bounds = array<i64: 2, 1>, scalar_prefetch = 0 : i64, scratch_operands = 0 : i64, tpu.core_type = #tpu.core_type<tc>, window_params = [{transform_indices = @transform_0, window_bounds = array<i64: 1, 4, 352>}, {transform_indices = @transform_1, window_bounds = array<i64: 13, 8, 4>}, {pipeline_mode = #tpu.pipeline_mode<synchronous>, transform_indices = @transform_2, window_bounds = array<i64: 1, 256>}, {transform_indices = @transform_3, window_bounds = array<i64: 8, 1>}, {transform_indices = @transform_4, window_bounds = array<i64: 1, 8, 256>}]} {
    %c0 = arith.constant 0 : index
    %c0_0 = arith.constant 0 : index
    %0 = vector.load %arg5[%c0, %c0_0] : memref<8x1xf32, #tpu.memory_space<vmem>>, vector<8x1xf32>
    %c0_1 = arith.constant 0 : index
    %c0_2 = arith.constant 0 : index
    %1 = vector.load %arg4[%c0_1, %c0_2] : memref<1x256xi32, #tpu.memory_space<vmem>>, vector<1x128xi32>
    %c0_3 = arith.constant 0 : index
    %c0_4 = arith.constant 0 : index
    %c45 = arith.constant 45 : index
    %2 = vector.load %arg2[%c0_3, %c0_4, %c45] : memref<1x4x352xf32, #tpu.memory_space<vmem>>, vector<1x4x128xf32>
    %3 = vector.shape_cast %2 : vector<1x4x128xf32> to vector<4x128xf32>
    %c-3_i32 = arith.constant -3 : i32
    %4 = vector.broadcast %c-3_i32 : i32 to vector<1x128xi32>
    %5 = arith.addi %1, %4 : vector<1x128xi32>
    %c0_i32 = arith.constant 0 : i32
    %6 = vector.broadcast %c0_i32 : i32 to vector<1x128xi32>
    %7 = arith.cmpi sge, %5, %6 : vector<1x128xi32>
    %c-3_i32_5 = arith.constant -3 : i32
    %8 = vector.broadcast %c-3_i32_5 : i32 to vector<1x128xi32>
    %9 = arith.addi %1, %8 : vector<1x128xi32>
    %c16_i32 = arith.constant 16 : i32
    %10 = vector.broadcast %c16_i32 : i32 to vector<1x128xi32>
    %11 = arith.cmpi slt, %9, %10 : vector<1x128xi32>
    %12 = arith.andi %7, %11 : vector<1x128xi1>
    %c0_i32_6 = arith.constant 0 : i32
    %13 = arith.sitofp %c0_i32_6 : i32 to f32
    %14 = vector.shape_cast %12 : vector<1x128xi1> to vector<1x128xi1>
    %15 = vector.broadcast %14 : vector<1x128xi1> to vector<4x128xi1>
    %16 = vector.broadcast %13 : f32 to vector<4x128xf32>
    %17 = arith.select %15, %3, %16 : vector<4x128xi1>, vector<4x128xf32>
    %c0_7 = arith.constant 0 : index
    %c0_8 = arith.constant 0 : index
    %c0_9 = arith.constant 0 : index
    %18 = vector.load %arg3[%c0_7, %c0_8, %c0_9] : memref<13x8x4xf32, #tpu.memory_space<vmem>>, vector<1x8x4xf32>
    %19 = vector.shape_cast %18 : vector<1x8x4xf32> to vector<8x4xf32>
    %cst = arith.constant dense<0.000000e+00> : vector<8x128xf32>
    %20 = tpu.matmul %19, %17, %cst {dimension_numbers = #tpu.dot_dimension_numbers<[1], [0], [0], [1], [0, 0, 1, 1], [], []>} : vector<8x4xf32>, vector<4x128xf32>, vector<8x128xf32> -> vector<8x128xf32>
    %21 = vector.broadcast %0 : vector<8x1xf32> to vector<8x128xf32>
    %22 = arith.addf %20, %21 : vector<8x128xf32>
    %c0_10 = arith.constant 0 : index
    %c0_11 = arith.constant 0 : index
    %c46 = arith.constant 46 : index
    %23 = vector.load %arg2[%c0_10, %c0_11, %c46] : memref<1x4x352xf32, #tpu.memory_space<vmem>>, vector<1x4x128xf32>
    %24 = vector.shape_cast %23 : vector<1x4x128xf32> to vector<4x128xf32>
    %c-2_i32 = arith.constant -2 : i32
    %25 = vector.broadcast %c-2_i32 : i32 to vector<1x128xi32>
    %26 = arith.addi %1, %25 : vector<1x128xi32>
    %c0_i32_12 = arith.constant 0 : i32
    %27 = vector.broadcast %c0_i32_12 : i32 to vector<1x128xi32>
    %28 = arith.cmpi sge, %26, %27 : vector<1x128xi32>
    %c-2_i32_13 = arith.constant -2 : i32
    %29 = vector.broadcast %c-2_i32_13 : i32 to vector<1x128xi32>
    %30 = arith.addi %1, %29 : vector<1x128xi32>
    %c16_i32_14 = arith.constant 16 : i32
    %31 = vector.broadcast %c16_i32_14 : i32 to vector<1x128xi32>
    %32 = arith.cmpi slt, %30, %31 : vector<1x128xi32>
    %33 = arith.andi %28, %32 : vector<1x128xi1>
    %c0_i32_15 = arith.constant 0 : i32
    %34 = arith.sitofp %c0_i32_15 : i32 to f32
    %35 = vector.shape_cast %33 : vector<1x128xi1> to vector<1x128xi1>
    %36 = vector.broadcast %35 : vector<1x128xi1> to vector<4x128xi1>
    %37 = vector.broadcast %34 : f32 to vector<4x128xf32>
    %38 = arith.select %36, %24, %37 : vector<4x128xi1>, vector<4x128xf32>
    %c1 = arith.constant 1 : index
    %c0_16 = arith.constant 0 : index
    %c0_17 = arith.constant 0 : index
    %39 = vector.load %arg3[%c1, %c0_16, %c0_17] : memref<13x8x4xf32, #tpu.memory_space<vmem>>, vector<1x8x4xf32>
    %40 = vector.shape_cast %39 : vector<1x8x4xf32> to vector<8x4xf32>
    %cst_18 = arith.constant dense<0.000000e+00> : vector<8x128xf32>
    %41 = tpu.matmul %40, %38, %cst_18 {dimension_numbers = #tpu.dot_dimension_numbers<[1], [0], [0], [1], [0, 0, 1, 1], [], []>} : vector<8x4xf32>, vector<4x128xf32>, vector<8x128xf32> -> vector<8x128xf32>
    %42 = arith.addf %22, %41 : vector<8x128xf32>
    %c0_19 = arith.constant 0 : index
    %c0_20 = arith.constant 0 : index
    %c47 = arith.constant 47 : index
    %43 = vector.load %arg2[%c0_19, %c0_20, %c47] : memref<1x4x352xf32, #tpu.memory_space<vmem>>, vector<1x4x128xf32>
    %44 = vector.shape_cast %43 : vector<1x4x128xf32> to vector<4x128xf32>
    %c-1_i32 = arith.constant -1 : i32
    %45 = vector.broadcast %c-1_i32 : i32 to vector<1x128xi32>
    %46 = arith.addi %1, %45 : vector<1x128xi32>
    %c0_i32_21 = arith.constant 0 : i32
    %47 = vector.broadcast %c0_i32_21 : i32 to vector<1x128xi32>
    %48 = arith.cmpi sge, %46, %47 : vector<1x128xi32>
    %c-1_i32_22 = arith.constant -1 : i32
    %49 = vector.broadcast %c-1_i32_22 : i32 to vector<1x128xi32>
    %50 = arith.addi %1, %49 : vector<1x128xi32>
    %c16_i32_23 = arith.constant 16 : i32
    %51 = vector.broadcast %c16_i32_23 : i32 to vector<1x128xi32>
    %52 = arith.cmpi slt, %50, %51 : vector<1x128xi32>
    %53 = arith.andi %48, %52 : vector<1x128xi1>
    %c0_i32_24 = arith.constant 0 : i32
    %54 = arith.sitofp %c0_i32_24 : i32 to f32
    %55 = vector.shape_cast %53 : vector<1x128xi1> to vector<1x128xi1>
    %56 = vector.broadcast %55 : vector<1x128xi1> to vector<4x128xi1>
    %57 = vector.broadcast %54 : f32 to vector<4x128xf32>
    %58 = arith.select %56, %44, %57 : vector<4x128xi1>, vector<4x128xf32>
    %c2 = arith.constant 2 : index
    %c0_25 = arith.constant 0 : index
    %c0_26 = arith.constant 0 : index
    %59 = vector.load %arg3[%c2, %c0_25, %c0_26] : memref<13x8x4xf32, #tpu.memory_space<vmem>>, vector<1x8x4xf32>
    %60 = vector.shape_cast %59 : vector<1x8x4xf32> to vector<8x4xf32>
    %cst_27 = arith.constant dense<0.000000e+00> : vector<8x128xf32>
    %61 = tpu.matmul %60, %58, %cst_27 {dimension_numbers = #tpu.dot_dimension_numbers<[1], [0], [0], [1], [0, 0, 1, 1], [], []>} : vector<8x4xf32>, vector<4x128xf32>, vector<8x128xf32> -> vector<8x128xf32>
    %62 = arith.addf %42, %61 : vector<8x128xf32>
    %c0_28 = arith.constant 0 : index
    %c0_29 = arith.constant 0 : index
    %c48 = arith.constant 48 : index
    %63 = vector.load %arg2[%c0_28, %c0_29, %c48] : memref<1x4x352xf32, #tpu.memory_space<vmem>>, vector<1x4x128xf32>
    %64 = vector.shape_cast %63 : vector<1x4x128xf32> to vector<4x128xf32>
    %c3 = arith.constant 3 : index
    %c0_30 = arith.constant 0 : index
    %c0_31 = arith.constant 0 : index
    %65 = vector.load %arg3[%c3, %c0_30, %c0_31] : memref<13x8x4xf32, #tpu.memory_space<vmem>>, vector<1x8x4xf32>
    %66 = vector.shape_cast %65 : vector<1x8x4xf32> to vector<8x4xf32>
    %cst_32 = arith.constant dense<0.000000e+00> : vector<8x128xf32>
    %67 = tpu.matmul %66, %64, %cst_32 {dimension_numbers = #tpu.dot_dimension_numbers<[1], [0], [0], [1], [0, 0, 1, 1], [], []>} : vector<8x4xf32>, vector<4x128xf32>, vector<8x128xf32> -> vector<8x128xf32>
    %68 = arith.addf %62, %67 : vector<8x128xf32>
    %c0_33 = arith.constant 0 : index
    %c0_34 = arith.constant 0 : index
    %c49 = arith.constant 49 : index
    %69 = vector.load %arg2[%c0_33, %c0_34, %c49] : memref<1x4x352xf32, #tpu.memory_space<vmem>>, vector<1x4x128xf32>
    %70 = vector.shape_cast %69 : vector<1x4x128xf32> to vector<4x128xf32>
    %c1_i32 = arith.constant 1 : i32
    %71 = vector.broadcast %c1_i32 : i32 to vector<1x128xi32>
    %72 = arith.addi %1, %71 : vector<1x128xi32>
    %c0_i32_35 = arith.constant 0 : i32
    %73 = vector.broadcast %c0_i32_35 : i32 to vector<1x128xi32>
    %74 = arith.cmpi sge, %72, %73 : vector<1x128xi32>
    %c1_i32_36 = arith.constant 1 : i32
    %75 = vector.broadcast %c1_i32_36 : i32 to vector<1x128xi32>
    %76 = arith.addi %1, %75 : vector<1x128xi32>
    %c16_i32_37 = arith.constant 16 : i32
    %77 = vector.broadcast %c16_i32_37 : i32 to vector<1x128xi32>
    %78 = arith.cmpi slt, %76, %77 : vector<1x128xi32>
    %79 = arith.andi %74, %78 : vector<1x128xi1>
    %c0_i32_38 = arith.constant 0 : i32
    %80 = arith.sitofp %c0_i32_38 : i32 to f32
    %81 = vector.shape_cast %79 : vector<1x128xi1> to vector<1x128xi1>
    %82 = vector.broadcast %81 : vector<1x128xi1> to vector<4x128xi1>
    %83 = vector.broadcast %80 : f32 to vector<4x128xf32>
    %84 = arith.select %82, %70, %83 : vector<4x128xi1>, vector<4x128xf32>
    %c4 = arith.constant 4 : index
    %c0_39 = arith.constant 0 : index
    %c0_40 = arith.constant 0 : index
    %85 = vector.load %arg3[%c4, %c0_39, %c0_40] : memref<13x8x4xf32, #tpu.memory_space<vmem>>, vector<1x8x4xf32>
    %86 = vector.shape_cast %85 : vector<1x8x4xf32> to vector<8x4xf32>
    %cst_41 = arith.constant dense<0.000000e+00> : vector<8x128xf32>
    %87 = tpu.matmul %86, %84, %cst_41 {dimension_numbers = #tpu.dot_dimension_numbers<[1], [0], [0], [1], [0, 0, 1, 1], [], []>} : vector<8x4xf32>, vector<4x128xf32>, vector<8x128xf32> -> vector<8x128xf32>
    %88 = arith.addf %68, %87 : vector<8x128xf32>
    %c0_42 = arith.constant 0 : index
    %c0_43 = arith.constant 0 : index
    %c50 = arith.constant 50 : index
    %89 = vector.load %arg2[%c0_42, %c0_43, %c50] : memref<1x4x352xf32, #tpu.memory_space<vmem>>, vector<1x4x128xf32>
    %90 = vector.shape_cast %89 : vector<1x4x128xf32> to vector<4x128xf32>
    %c2_i32 = arith.constant 2 : i32
    %91 = vector.broadcast %c2_i32 : i32 to vector<1x128xi32>
    %92 = arith.addi %1, %91 : vector<1x128xi32>
    %c0_i32_44 = arith.constant 0 : i32
    %93 = vector.broadcast %c0_i32_44 : i32 to vector<1x128xi32>
    %94 = arith.cmpi sge, %92, %93 : vector<1x128xi32>
    %c2_i32_45 = arith.constant 2 : i32
    %95 = vector.broadcast %c2_i32_45 : i32 to vector<1x128xi32>
    %96 = arith.addi %1, %95 : vector<1x128xi32>
    %c16_i32_46 = arith.constant 16 : i32
    %97 = vector.broadcast %c16_i32_46 : i32 to vector<1x128xi32>
    %98 = arith.cmpi slt, %96, %97 : vector<1x128xi32>
    %99 = arith.andi %94, %98 : vector<1x128xi1>
    %c0_i32_47 = arith.constant 0 : i32
    %100 = arith.sitofp %c0_i32_47 : i32 to f32
    %101 = vector.shape_cast %99 : vector<1x128xi1> to vector<1x128xi1>
    %102 = vector.broadcast %101 : vector<1x128xi1> to vector<4x128xi1>
    %103 = vector.broadcast %100 : f32 to vector<4x128xf32>
    %104 = arith.select %102, %90, %103 : vector<4x128xi1>, vector<4x128xf32>
    %c5 = arith.constant 5 : index
    %c0_48 = arith.constant 0 : index
    %c0_49 = arith.constant 0 : index
    %105 = vector.load %arg3[%c5, %c0_48, %c0_49] : memref<13x8x4xf32, #tpu.memory_space<vmem>>, vector<1x8x4xf32>
    %106 = vector.shape_cast %105 : vector<1x8x4xf32> to vector<8x4xf32>
    %cst_50 = arith.constant dense<0.000000e+00> : vector<8x128xf32>
    %107 = tpu.matmul %106, %104, %cst_50 {dimension_numbers = #tpu.dot_dimension_numbers<[1], [0], [0], [1], [0, 0, 1, 1], [], []>} : vector<8x4xf32>, vector<4x128xf32>, vector<8x128xf32> -> vector<8x128xf32>
    %108 = arith.addf %88, %107 : vector<8x128xf32>
    %c0_51 = arith.constant 0 : index
    %c0_52 = arith.constant 0 : index
    %c51 = arith.constant 51 : index
    %109 = vector.load %arg2[%c0_51, %c0_52, %c51] : memref<1x4x352xf32, #tpu.memory_space<vmem>>, vector<1x4x128xf32>
    %110 = vector.shape_cast %109 : vector<1x4x128xf32> to vector<4x128xf32>
    %c3_i32 = arith.constant 3 : i32
    %111 = vector.broadcast %c3_i32 : i32 to vector<1x128xi32>
    %112 = arith.addi %1, %111 : vector<1x128xi32>
    %c0_i32_53 = arith.constant 0 : i32
    %113 = vector.broadcast %c0_i32_53 : i32 to vector<1x128xi32>
    %114 = arith.cmpi sge, %112, %113 : vector<1x128xi32>
    %c3_i32_54 = arith.constant 3 : i32
    %115 = vector.broadcast %c3_i32_54 : i32 to vector<1x128xi32>
    %116 = arith.addi %1, %115 : vector<1x128xi32>
    %c16_i32_55 = arith.constant 16 : i32
    %117 = vector.broadcast %c16_i32_55 : i32 to vector<1x128xi32>
    %118 = arith.cmpi slt, %116, %117 : vector<1x128xi32>
    %119 = arith.andi %114, %118 : vector<1x128xi1>
    %c0_i32_56 = arith.constant 0 : i32
    %120 = arith.sitofp %c0_i32_56 : i32 to f32
    %121 = vector.shape_cast %119 : vector<1x128xi1> to vector<1x128xi1>
    %122 = vector.broadcast %121 : vector<1x128xi1> to vector<4x128xi1>
    %123 = vector.broadcast %120 : f32 to vector<4x128xf32>
    %124 = arith.select %122, %110, %123 : vector<4x128xi1>, vector<4x128xf32>
    %c6 = arith.constant 6 : index
    %c0_57 = arith.constant 0 : index
    %c0_58 = arith.constant 0 : index
    %125 = vector.load %arg3[%c6, %c0_57, %c0_58] : memref<13x8x4xf32, #tpu.memory_space<vmem>>, vector<1x8x4xf32>
    %126 = vector.shape_cast %125 : vector<1x8x4xf32> to vector<8x4xf32>
    %cst_59 = arith.constant dense<0.000000e+00> : vector<8x128xf32>
    %127 = tpu.matmul %126, %124, %cst_59 {dimension_numbers = #tpu.dot_dimension_numbers<[1], [0], [0], [1], [0, 0, 1, 1], [], []>} : vector<8x4xf32>, vector<4x128xf32>, vector<8x128xf32> -> vector<8x128xf32>
    %128 = arith.addf %108, %127 : vector<8x128xf32>
    %c0_60 = arith.constant 0 : index
    %c0_61 = arith.constant 0 : index
    %c0_62 = arith.constant 0 : index
    %129 = vector.load %arg2[%c0_60, %c0_61, %c0_62] : memref<1x4x352xf32, #tpu.memory_space<vmem>>, vector<1x4x128xf32>
    %130 = vector.shape_cast %129 : vector<1x4x128xf32> to vector<4x128xf32>
    %c7 = arith.constant 7 : index
    %c0_63 = arith.constant 0 : index
    %c0_64 = arith.constant 0 : index
    %131 = vector.load %arg3[%c7, %c0_63, %c0_64] : memref<13x8x4xf32, #tpu.memory_space<vmem>>, vector<1x8x4xf32>
    %132 = vector.shape_cast %131 : vector<1x8x4xf32> to vector<8x4xf32>
    %cst_65 = arith.constant dense<0.000000e+00> : vector<8x128xf32>
    %133 = tpu.matmul %132, %130, %cst_65 {dimension_numbers = #tpu.dot_dimension_numbers<[1], [0], [0], [1], [0, 0, 1, 1], [], []>} : vector<8x4xf32>, vector<4x128xf32>, vector<8x128xf32> -> vector<8x128xf32>
    %134 = arith.addf %128, %133 : vector<8x128xf32>
    %c0_66 = arith.constant 0 : index
    %c0_67 = arith.constant 0 : index
    %c16 = arith.constant 16 : index
    %135 = vector.load %arg2[%c0_66, %c0_67, %c16] : memref<1x4x352xf32, #tpu.memory_space<vmem>>, vector<1x4x128xf32>
    %136 = vector.shape_cast %135 : vector<1x4x128xf32> to vector<4x128xf32>
    %c8 = arith.constant 8 : index
    %c0_68 = arith.constant 0 : index
    %c0_69 = arith.constant 0 : index
    %137 = vector.load %arg3[%c8, %c0_68, %c0_69] : memref<13x8x4xf32, #tpu.memory_space<vmem>>, vector<1x8x4xf32>
    %138 = vector.shape_cast %137 : vector<1x8x4xf32> to vector<8x4xf32>
    %cst_70 = arith.constant dense<0.000000e+00> : vector<8x128xf32>
    %139 = tpu.matmul %138, %136, %cst_70 {dimension_numbers = #tpu.dot_dimension_numbers<[1], [0], [0], [1], [0, 0, 1, 1], [], []>} : vector<8x4xf32>, vector<4x128xf32>, vector<8x128xf32> -> vector<8x128xf32>
    %140 = arith.addf %134, %139 : vector<8x128xf32>
    %c0_71 = arith.constant 0 : index
    %c0_72 = arith.constant 0 : index
    %c32 = arith.constant 32 : index
    %141 = vector.load %arg2[%c0_71, %c0_72, %c32] : memref<1x4x352xf32, #tpu.memory_space<vmem>>, vector<1x4x128xf32>
    %142 = vector.shape_cast %141 : vector<1x4x128xf32> to vector<4x128xf32>
    %c9 = arith.constant 9 : index
    %c0_73 = arith.constant 0 : index
    %c0_74 = arith.constant 0 : index
    %143 = vector.load %arg3[%c9, %c0_73, %c0_74] : memref<13x8x4xf32, #tpu.memory_space<vmem>>, vector<1x8x4xf32>
    %144 = vector.shape_cast %143 : vector<1x8x4xf32> to vector<8x4xf32>
    %cst_75 = arith.constant dense<0.000000e+00> : vector<8x128xf32>
    %145 = tpu.matmul %144, %142, %cst_75 {dimension_numbers = #tpu.dot_dimension_numbers<[1], [0], [0], [1], [0, 0, 1, 1], [], []>} : vector<8x4xf32>, vector<4x128xf32>, vector<8x128xf32> -> vector<8x128xf32>
    %146 = arith.addf %140, %145 : vector<8x128xf32>
    %c0_76 = arith.constant 0 : index
    %c0_77 = arith.constant 0 : index
    %c64 = arith.constant 64 : index
    %147 = vector.load %arg2[%c0_76, %c0_77, %c64] : memref<1x4x352xf32, #tpu.memory_space<vmem>>, vector<1x4x128xf32>
    %148 = vector.shape_cast %147 : vector<1x4x128xf32> to vector<4x128xf32>
    %c10 = arith.constant 10 : index
    %c0_78 = arith.constant 0 : index
    %c0_79 = arith.constant 0 : index
    %149 = vector.load %arg3[%c10, %c0_78, %c0_79] : memref<13x8x4xf32, #tpu.memory_space<vmem>>, vector<1x8x4xf32>
    %150 = vector.shape_cast %149 : vector<1x8x4xf32> to vector<8x4xf32>
    %cst_80 = arith.constant dense<0.000000e+00> : vector<8x128xf32>
    %151 = tpu.matmul %150, %148, %cst_80 {dimension_numbers = #tpu.dot_dimension_numbers<[1], [0], [0], [1], [0, 0, 1, 1], [], []>} : vector<8x4xf32>, vector<4x128xf32>, vector<8x128xf32> -> vector<8x128xf32>
    %152 = arith.addf %146, %151 : vector<8x128xf32>
    %c0_81 = arith.constant 0 : index
    %c0_82 = arith.constant 0 : index
    %c80 = arith.constant 80 : index
    %153 = vector.load %arg2[%c0_81, %c0_82, %c80] : memref<1x4x352xf32, #tpu.memory_space<vmem>>, vector<1x4x128xf32>
    %154 = vector.shape_cast %153 : vector<1x4x128xf32> to vector<4x128xf32>
    %c11 = arith.constant 11 : index
    %c0_83 = arith.constant 0 : index
    %c0_84 = arith.constant 0 : index
    %155 = vector.load %arg3[%c11, %c0_83, %c0_84] : memref<13x8x4xf32, #tpu.memory_space<vmem>>, vector<1x8x4xf32>
    %156 = vector.shape_cast %155 : vector<1x8x4xf32> to vector<8x4xf32>
    %cst_85 = arith.constant dense<0.000000e+00> : vector<8x128xf32>
    %157 = tpu.matmul %156, %154, %cst_85 {dimension_numbers = #tpu.dot_dimension_numbers<[1], [0], [0], [1], [0, 0, 1, 1], [], []>} : vector<8x4xf32>, vector<4x128xf32>, vector<8x128xf32> -> vector<8x128xf32>
    %158 = arith.addf %152, %157 : vector<8x128xf32>
    %c0_86 = arith.constant 0 : index
    %c0_87 = arith.constant 0 : index
    %c96 = arith.constant 96 : index
    %159 = vector.load %arg2[%c0_86, %c0_87, %c96] : memref<1x4x352xf32, #tpu.memory_space<vmem>>, vector<1x4x128xf32>
    %160 = vector.shape_cast %159 : vector<1x4x128xf32> to vector<4x128xf32>
    %c12 = arith.constant 12 : index
    %c0_88 = arith.constant 0 : index
    %c0_89 = arith.constant 0 : index
    %161 = vector.load %arg3[%c12, %c0_88, %c0_89] : memref<13x8x4xf32, #tpu.memory_space<vmem>>, vector<1x8x4xf32>
    %162 = vector.shape_cast %161 : vector<1x8x4xf32> to vector<8x4xf32>
    %cst_90 = arith.constant dense<0.000000e+00> : vector<8x128xf32>
    %163 = tpu.matmul %162, %160, %cst_90 {dimension_numbers = #tpu.dot_dimension_numbers<[1], [0], [0], [1], [0, 0, 1, 1], [], []>} : vector<8x4xf32>, vector<4x128xf32>, vector<8x128xf32> -> vector<8x128xf32>
    %164 = arith.addf %158, %163 : vector<8x128xf32>
    %c0_91 = arith.constant 0 : index
    %c0_92 = arith.constant 0 : index
    %c0_93 = arith.constant 0 : index
    %165 = vector.load %arg6[%c0_91, %c0_92, %c0_93] : memref<1x8x256xf32, #tpu.memory_space<vmem>>, vector<1x8x128xf32>
    %166 = vector.shape_cast %165 : vector<1x8x128xf32> to vector<8x128xf32>
    %167 = vector.shape_cast %164 : vector<8x128xf32> to vector<1x8x128xf32>
    tpu.vector_store %arg6[%c0_91, %c0_92, %c0_93], %167 {strides = array<i32>} : memref<1x8x256xf32, #tpu.memory_space<vmem>>, vector<1x8x128xf32>,
    %c0_94 = arith.constant 0 : index
    %c128 = arith.constant 128 : index
    %168 = vector.load %arg4[%c0_94, %c128] : memref<1x256xi32, #tpu.memory_space<vmem>>, vector<1x128xi32>
    %c0_95 = arith.constant 0 : index
    %c0_96 = arith.constant 0 : index
    %c173 = arith.constant 173 : index
    %169 = vector.load %arg2[%c0_95, %c0_96, %c173] : memref<1x4x352xf32, #tpu.memory_space<vmem>>, vector<1x4x128xf32>
    %170 = vector.shape_cast %169 : vector<1x4x128xf32> to vector<4x128xf32>
    %c-3_i32_97 = arith.constant -3 : i32
    %171 = vector.broadcast %c-3_i32_97 : i32 to vector<1x128xi32>
    %172 = arith.addi %168, %171 : vector<1x128xi32>
    %c0_i32_98 = arith.constant 0 : i32
    %173 = vector.broadcast %c0_i32_98 : i32 to vector<1x128xi32>
    %174 = arith.cmpi sge, %172, %173 : vector<1x128xi32>
    %c-3_i32_99 = arith.constant -3 : i32
    %175 = vector.broadcast %c-3_i32_99 : i32 to vector<1x128xi32>
    %176 = arith.addi %168, %175 : vector<1x128xi32>
    %c16_i32_100 = arith.constant 16 : i32
    %177 = vector.broadcast %c16_i32_100 : i32 to vector<1x128xi32>
    %178 = arith.cmpi slt, %176, %177 : vector<1x128xi32>
    %179 = arith.andi %174, %178 : vector<1x128xi1>
    %c0_i32_101 = arith.constant 0 : i32
    %180 = arith.sitofp %c0_i32_101 : i32 to f32
    %181 = vector.shape_cast %179 : vector<1x128xi1> to vector<1x128xi1>
    %182 = vector.broadcast %181 : vector<1x128xi1> to vector<4x128xi1>
    %183 = vector.broadcast %180 : f32 to vector<4x128xf32>
    %184 = arith.select %182, %170, %183 : vector<4x128xi1>, vector<4x128xf32>
    %c0_102 = arith.constant 0 : index
    %c0_103 = arith.constant 0 : index
    %c0_104 = arith.constant 0 : index
    %185 = vector.load %arg3[%c0_102, %c0_103, %c0_104] : memref<13x8x4xf32, #tpu.memory_space<vmem>>, vector<1x8x4xf32>
    %186 = vector.shape_cast %185 : vector<1x8x4xf32> to vector<8x4xf32>
    %cst_105 = arith.constant dense<0.000000e+00> : vector<8x128xf32>
    %187 = tpu.matmul %186, %184, %cst_105 {dimension_numbers = #tpu.dot_dimension_numbers<[1], [0], [0], [1], [0, 0, 1, 1], [], []>} : vector<8x4xf32>, vector<4x128xf32>, vector<8x128xf32> -> vector<8x128xf32>
    %188 = vector.broadcast %0 : vector<8x1xf32> to vector<8x128xf32>
    %189 = arith.addf %187, %188 : vector<8x128xf32>
    %c0_106 = arith.constant 0 : index
    %c0_107 = arith.constant 0 : index
    %c174 = arith.constant 174 : index
    %190 = vector.load %arg2[%c0_106, %c0_107, %c174] : memref<1x4x352xf32, #tpu.memory_space<vmem>>, vector<1x4x128xf32>
    %191 = vector.shape_cast %190 : vector<1x4x128xf32> to vector<4x128xf32>
    %c-2_i32_108 = arith.constant -2 : i32
    %192 = vector.broadcast %c-2_i32_108 : i32 to vector<1x128xi32>
    %193 = arith.addi %168, %192 : vector<1x128xi32>
    %c0_i32_109 = arith.constant 0 : i32
    %194 = vector.broadcast %c0_i32_109 : i32 to vector<1x128xi32>
    %195 = arith.cmpi sge, %193, %194 : vector<1x128xi32>
    %c-2_i32_110 = arith.constant -2 : i32
    %196 = vector.broadcast %c-2_i32_110 : i32 to vector<1x128xi32>
    %197 = arith.addi %168, %196 : vector<1x128xi32>
    %c16_i32_111 = arith.constant 16 : i32
    %198 = vector.broadcast %c16_i32_111 : i32 to vector<1x128xi32>
    %199 = arith.cmpi slt, %197, %198 : vector<1x128xi32>
    %200 = arith.andi %195, %199 : vector<1x128xi1>
    %c0_i32_112 = arith.constant 0 : i32
    %201 = arith.sitofp %c0_i32_112 : i32 to f32
    %202 = vector.shape_cast %200 : vector<1x128xi1> to vector<1x128xi1>
    %203 = vector.broadcast %202 : vector<1x128xi1> to vector<4x128xi1>
    %204 = vector.broadcast %201 : f32 to vector<4x128xf32>
    %205 = arith.select %203, %191, %204 : vector<4x128xi1>, vector<4x128xf32>
    %c1_113 = arith.constant 1 : index
    %c0_114 = arith.constant 0 : index
    %c0_115 = arith.constant 0 : index
    %206 = vector.load %arg3[%c1_113, %c0_114, %c0_115] : memref<13x8x4xf32, #tpu.memory_space<vmem>>, vector<1x8x4xf32>
    %207 = vector.shape_cast %206 : vector<1x8x4xf32> to vector<8x4xf32>
    %cst_116 = arith.constant dense<0.000000e+00> : vector<8x128xf32>
    %208 = tpu.matmul %207, %205, %cst_116 {dimension_numbers = #tpu.dot_dimension_numbers<[1], [0], [0], [1], [0, 0, 1, 1], [], []>} : vector<8x4xf32>, vector<4x128xf32>, vector<8x128xf32> -> vector<8x128xf32>
    %209 = arith.addf %189, %208 : vector<8x128xf32>
    %c0_117 = arith.constant 0 : index
    %c0_118 = arith.constant 0 : index
    %c175 = arith.constant 175 : index
    %210 = vector.load %arg2[%c0_117, %c0_118, %c175] : memref<1x4x352xf32, #tpu.memory_space<vmem>>, vector<1x4x128xf32>
    %211 = vector.shape_cast %210 : vector<1x4x128xf32> to vector<4x128xf32>
    %c-1_i32_119 = arith.constant -1 : i32
    %212 = vector.broadcast %c-1_i32_119 : i32 to vector<1x128xi32>
    %213 = arith.addi %168, %212 : vector<1x128xi32>
    %c0_i32_120 = arith.constant 0 : i32
    %214 = vector.broadcast %c0_i32_120 : i32 to vector<1x128xi32>
    %215 = arith.cmpi sge, %213, %214 : vector<1x128xi32>
    %c-1_i32_121 = arith.constant -1 : i32
    %216 = vector.broadcast %c-1_i32_121 : i32 to vector<1x128xi32>
    %217 = arith.addi %168, %216 : vector<1x128xi32>
    %c16_i32_122 = arith.constant 16 : i32
    %218 = vector.broadcast %c16_i32_122 : i32 to vector<1x128xi32>
    %219 = arith.cmpi slt, %217, %218 : vector<1x128xi32>
    %220 = arith.andi %215, %219 : vector<1x128xi1>
    %c0_i32_123 = arith.constant 0 : i32
    %221 = arith.sitofp %c0_i32_123 : i32 to f32
    %222 = vector.shape_cast %220 : vector<1x128xi1> to vector<1x128xi1>
    %223 = vector.broadcast %222 : vector<1x128xi1> to vector<4x128xi1>
    %224 = vector.broadcast %221 : f32 to vector<4x128xf32>
    %225 = arith.select %223, %211, %224 : vector<4x128xi1>, vector<4x128xf32>
    %c2_124 = arith.constant 2 : index
    %c0_125 = arith.constant 0 : index
    %c0_126 = arith.constant 0 : index
    %226 = vector.load %arg3[%c2_124, %c0_125, %c0_126] : memref<13x8x4xf32, #tpu.memory_space<vmem>>, vector<1x8x4xf32>
    %227 = vector.shape_cast %226 : vector<1x8x4xf32> to vector<8x4xf32>
    %cst_127 = arith.constant dense<0.000000e+00> : vector<8x128xf32>
    %228 = tpu.matmul %227, %225, %cst_127 {dimension_numbers = #tpu.dot_dimension_numbers<[1], [0], [0], [1], [0, 0, 1, 1], [], []>} : vector<8x4xf32>, vector<4x128xf32>, vector<8x128xf32> -> vector<8x128xf32>
    %229 = arith.addf %209, %228 : vector<8x128xf32>
    %c0_128 = arith.constant 0 : index
    %c0_129 = arith.constant 0 : index
    %c176 = arith.constant 176 : index
    %230 = vector.load %arg2[%c0_128, %c0_129, %c176] : memref<1x4x352xf32, #tpu.memory_space<vmem>>, vector<1x4x128xf32>
    %231 = vector.shape_cast %230 : vector<1x4x128xf32> to vector<4x128xf32>
    %c3_130 = arith.constant 3 : index
    %c0_131 = arith.constant 0 : index
    %c0_132 = arith.constant 0 : index
    %232 = vector.load %arg3[%c3_130, %c0_131, %c0_132] : memref<13x8x4xf32, #tpu.memory_space<vmem>>, vector<1x8x4xf32>
    %233 = vector.shape_cast %232 : vector<1x8x4xf32> to vector<8x4xf32>
    %cst_133 = arith.constant dense<0.000000e+00> : vector<8x128xf32>
    %234 = tpu.matmul %233, %231, %cst_133 {dimension_numbers = #tpu.dot_dimension_numbers<[1], [0], [0], [1], [0, 0, 1, 1], [], []>} : vector<8x4xf32>, vector<4x128xf32>, vector<8x128xf32> -> vector<8x128xf32>
    %235 = arith.addf %229, %234 : vector<8x128xf32>
    %c0_134 = arith.constant 0 : index
    %c0_135 = arith.constant 0 : index
    %c177 = arith.constant 177 : index
    %236 = vector.load %arg2[%c0_134, %c0_135, %c177] : memref<1x4x352xf32, #tpu.memory_space<vmem>>, vector<1x4x128xf32>
    %237 = vector.shape_cast %236 : vector<1x4x128xf32> to vector<4x128xf32>
    %c1_i32_136 = arith.constant 1 : i32
    %238 = vector.broadcast %c1_i32_136 : i32 to vector<1x128xi32>
    %239 = arith.addi %168, %238 : vector<1x128xi32>
    %c0_i32_137 = arith.constant 0 : i32
    %240 = vector.broadcast %c0_i32_137 : i32 to vector<1x128xi32>
    %241 = arith.cmpi sge, %239, %240 : vector<1x128xi32>
    %c1_i32_138 = arith.constant 1 : i32
    %242 = vector.broadcast %c1_i32_138 : i32 to vector<1x128xi32>
    %243 = arith.addi %168, %242 : vector<1x128xi32>
    %c16_i32_139 = arith.constant 16 : i32
    %244 = vector.broadcast %c16_i32_139 : i32 to vector<1x128xi32>
    %245 = arith.cmpi slt, %243, %244 : vector<1x128xi32>
    %246 = arith.andi %241, %245 : vector<1x128xi1>
    %c0_i32_140 = arith.constant 0 : i32
    %247 = arith.sitofp %c0_i32_140 : i32 to f32
    %248 = vector.shape_cast %246 : vector<1x128xi1> to vector<1x128xi1>
    %249 = vector.broadcast %248 : vector<1x128xi1> to vector<4x128xi1>
    %250 = vector.broadcast %247 : f32 to vector<4x128xf32>
    %251 = arith.select %249, %237, %250 : vector<4x128xi1>, vector<4x128xf32>
    %c4_141 = arith.constant 4 : index
    %c0_142 = arith.constant 0 : index
    %c0_143 = arith.constant 0 : index
    %252 = vector.load %arg3[%c4_141, %c0_142, %c0_143] : memref<13x8x4xf32, #tpu.memory_space<vmem>>, vector<1x8x4xf32>
    %253 = vector.shape_cast %252 : vector<1x8x4xf32> to vector<8x4xf32>
    %cst_144 = arith.constant dense<0.000000e+00> : vector<8x128xf32>
    %254 = tpu.matmul %253, %251, %cst_144 {dimension_numbers = #tpu.dot_dimension_numbers<[1], [0], [0], [1], [0, 0, 1, 1], [], []>} : vector<8x4xf32>, vector<4x128xf32>, vector<8x128xf32> -> vector<8x128xf32>
    %255 = arith.addf %235, %254 : vector<8x128xf32>
    %c0_145 = arith.constant 0 : index
    %c0_146 = arith.constant 0 : index
    %c178 = arith.constant 178 : index
    %256 = vector.load %arg2[%c0_145, %c0_146, %c178] : memref<1x4x352xf32, #tpu.memory_space<vmem>>, vector<1x4x128xf32>
    %257 = vector.shape_cast %256 : vector<1x4x128xf32> to vector<4x128xf32>
    %c2_i32_147 = arith.constant 2 : i32
    %258 = vector.broadcast %c2_i32_147 : i32 to vector<1x128xi32>
    %259 = arith.addi %168, %258 : vector<1x128xi32>
    %c0_i32_148 = arith.constant 0 : i32
    %260 = vector.broadcast %c0_i32_148 : i32 to vector<1x128xi32>
    %261 = arith.cmpi sge, %259, %260 : vector<1x128xi32>
    %c2_i32_149 = arith.constant 2 : i32
    %262 = vector.broadcast %c2_i32_149 : i32 to vector<1x128xi32>
    %263 = arith.addi %168, %262 : vector<1x128xi32>
    %c16_i32_150 = arith.constant 16 : i32
    %264 = vector.broadcast %c16_i32_150 : i32 to vector<1x128xi32>
    %265 = arith.cmpi slt, %263, %264 : vector<1x128xi32>
    %266 = arith.andi %261, %265 : vector<1x128xi1>
    %c0_i32_151 = arith.constant 0 : i32
    %267 = arith.sitofp %c0_i32_151 : i32 to f32
    %268 = vector.shape_cast %266 : vector<1x128xi1> to vector<1x128xi1>
    %269 = vector.broadcast %268 : vector<1x128xi1> to vector<4x128xi1>
    %270 = vector.broadcast %267 : f32 to vector<4x128xf32>
    %271 = arith.select %269, %257, %270 : vector<4x128xi1>, vector<4x128xf32>
    %c5_152 = arith.constant 5 : index
    %c0_153 = arith.constant 0 : index
    %c0_154 = arith.constant 0 : index
    %272 = vector.load %arg3[%c5_152, %c0_153, %c0_154] : memref<13x8x4xf32, #tpu.memory_space<vmem>>, vector<1x8x4xf32>
    %273 = vector.shape_cast %272 : vector<1x8x4xf32> to vector<8x4xf32>
    %cst_155 = arith.constant dense<0.000000e+00> : vector<8x128xf32>
    %274 = tpu.matmul %273, %271, %cst_155 {dimension_numbers = #tpu.dot_dimension_numbers<[1], [0], [0], [1], [0, 0, 1, 1], [], []>} : vector<8x4xf32>, vector<4x128xf32>, vector<8x128xf32> -> vector<8x128xf32>
    %275 = arith.addf %255, %274 : vector<8x128xf32>
    %c0_156 = arith.constant 0 : index
    %c0_157 = arith.constant 0 : index
    %c179 = arith.constant 179 : index
    %276 = vector.load %arg2[%c0_156, %c0_157, %c179] : memref<1x4x352xf32, #tpu.memory_space<vmem>>, vector<1x4x128xf32>
    %277 = vector.shape_cast %276 : vector<1x4x128xf32> to vector<4x128xf32>
    %c3_i32_158 = arith.constant 3 : i32
    %278 = vector.broadcast %c3_i32_158 : i32 to vector<1x128xi32>
    %279 = arith.addi %168, %278 : vector<1x128xi32>
    %c0_i32_159 = arith.constant 0 : i32
    %280 = vector.broadcast %c0_i32_159 : i32 to vector<1x128xi32>
    %281 = arith.cmpi sge, %279, %280 : vector<1x128xi32>
    %c3_i32_160 = arith.constant 3 : i32
    %282 = vector.broadcast %c3_i32_160 : i32 to vector<1x128xi32>
    %283 = arith.addi %168, %282 : vector<1x128xi32>
    %c16_i32_161 = arith.constant 16 : i32
    %284 = vector.broadcast %c16_i32_161 : i32 to vector<1x128xi32>
    %285 = arith.cmpi slt, %283, %284 : vector<1x128xi32>
    %286 = arith.andi %281, %285 : vector<1x128xi1>
    %c0_i32_162 = arith.constant 0 : i32
    %287 = arith.sitofp %c0_i32_162 : i32 to f32
    %288 = vector.shape_cast %286 : vector<1x128xi1> to vector<1x128xi1>
    %289 = vector.broadcast %288 : vector<1x128xi1> to vector<4x128xi1>
    %290 = vector.broadcast %287 : f32 to vector<4x128xf32>
    %291 = arith.select %289, %277, %290 : vector<4x128xi1>, vector<4x128xf32>
    %c6_163 = arith.constant 6 : index
    %c0_164 = arith.constant 0 : index
    %c0_165 = arith.constant 0 : index
    %292 = vector.load %arg3[%c6_163, %c0_164, %c0_165] : memref<13x8x4xf32, #tpu.memory_space<vmem>>, vector<1x8x4xf32>
    %293 = vector.shape_cast %292 : vector<1x8x4xf32> to vector<8x4xf32>
    %cst_166 = arith.constant dense<0.000000e+00> : vector<8x128xf32>
    %294 = tpu.matmul %293, %291, %cst_166 {dimension_numbers = #tpu.dot_dimension_numbers<[1], [0], [0], [1], [0, 0, 1, 1], [], []>} : vector<8x4xf32>, vector<4x128xf32>, vector<8x128xf32> -> vector<8x128xf32>
    %295 = arith.addf %275, %294 : vector<8x128xf32>
    %c0_167 = arith.constant 0 : index
    %c0_168 = arith.constant 0 : index
    %c128_169 = arith.constant 128 : index
    %296 = vector.load %arg2[%c0_167, %c0_168, %c128_169] : memref<1x4x352xf32, #tpu.memory_space<vmem>>, vector<1x4x128xf32>
    %297 = vector.shape_cast %296 : vector<1x4x128xf32> to vector<4x128xf32>
    %c7_170 = arith.constant 7 : index
    %c0_171 = arith.constant 0 : index
    %c0_172 = arith.constant 0 : index
    %298 = vector.load %arg3[%c7_170, %c0_171, %c0_172] : memref<13x8x4xf32, #tpu.memory_space<vmem>>, vector<1x8x4xf32>
    %299 = vector.shape_cast %298 : vector<1x8x4xf32> to vector<8x4xf32>
    %cst_173 = arith.constant dense<0.000000e+00> : vector<8x128xf32>
    %300 = tpu.matmul %299, %297, %cst_173 {dimension_numbers = #tpu.dot_dimension_numbers<[1], [0], [0], [1], [0, 0, 1, 1], [], []>} : vector<8x4xf32>, vector<4x128xf32>, vector<8x128xf32> -> vector<8x128xf32>
    %301 = arith.addf %295, %300 : vector<8x128xf32>
    %c0_174 = arith.constant 0 : index
    %c0_175 = arith.constant 0 : index
    %c144 = arith.constant 144 : index
    %302 = vector.load %arg2[%c0_174, %c0_175, %c144] : memref<1x4x352xf32, #tpu.memory_space<vmem>>, vector<1x4x128xf32>
    %303 = vector.shape_cast %302 : vector<1x4x128xf32> to vector<4x128xf32>
    %c8_176 = arith.constant 8 : index
    %c0_177 = arith.constant 0 : index
    %c0_178 = arith.constant 0 : index
    %304 = vector.load %arg3[%c8_176, %c0_177, %c0_178] : memref<13x8x4xf32, #tpu.memory_space<vmem>>, vector<1x8x4xf32>
    %305 = vector.shape_cast %304 : vector<1x8x4xf32> to vector<8x4xf32>
    %cst_179 = arith.constant dense<0.000000e+00> : vector<8x128xf32>
    %306 = tpu.matmul %305, %303, %cst_179 {dimension_numbers = #tpu.dot_dimension_numbers<[1], [0], [0], [1], [0, 0, 1, 1], [], []>} : vector<8x4xf32>, vector<4x128xf32>, vector<8x128xf32> -> vector<8x128xf32>
    %307 = arith.addf %301, %306 : vector<8x128xf32>
    %c0_180 = arith.constant 0 : index
    %c0_181 = arith.constant 0 : index
    %c160 = arith.constant 160 : index
    %308 = vector.load %arg2[%c0_180, %c0_181, %c160] : memref<1x4x352xf32, #tpu.memory_space<vmem>>, vector<1x4x128xf32>
    %309 = vector.shape_cast %308 : vector<1x4x128xf32> to vector<4x128xf32>
    %c9_182 = arith.constant 9 : index
    %c0_183 = arith.constant 0 : index
    %c0_184 = arith.constant 0 : index
    %310 = vector.load %arg3[%c9_182, %c0_183, %c0_184] : memref<13x8x4xf32, #tpu.memory_space<vmem>>, vector<1x8x4xf32>
    %311 = vector.shape_cast %310 : vector<1x8x4xf32> to vector<8x4xf32>
    %cst_185 = arith.constant dense<0.000000e+00> : vector<8x128xf32>
    %312 = tpu.matmul %311, %309, %cst_185 {dimension_numbers = #tpu.dot_dimension_numbers<[1], [0], [0], [1], [0, 0, 1, 1], [], []>} : vector<8x4xf32>, vector<4x128xf32>, vector<8x128xf32> -> vector<8x128xf32>
    %313 = arith.addf %307, %312 : vector<8x128xf32>
    %c0_186 = arith.constant 0 : index
    %c0_187 = arith.constant 0 : index
    %c192 = arith.constant 192 : index
    %314 = vector.load %arg2[%c0_186, %c0_187, %c192] : memref<1x4x352xf32, #tpu.memory_space<vmem>>, vector<1x4x128xf32>
    %315 = vector.shape_cast %314 : vector<1x4x128xf32> to vector<4x128xf32>
    %c10_188 = arith.constant 10 : index
    %c0_189 = arith.constant 0 : index
    %c0_190 = arith.constant 0 : index
    %316 = vector.load %arg3[%c10_188, %c0_189, %c0_190] : memref<13x8x4xf32, #tpu.memory_space<vmem>>, vector<1x8x4xf32>
    %317 = vector.shape_cast %316 : vector<1x8x4xf32> to vector<8x4xf32>
    %cst_191 = arith.constant dense<0.000000e+00> : vector<8x128xf32>
    %318 = tpu.matmul %317, %315, %cst_191 {dimension_numbers = #tpu.dot_dimension_numbers<[1], [0], [0], [1], [0, 0, 1, 1], [], []>} : vector<8x4xf32>, vector<4x128xf32>, vector<8x128xf32> -> vector<8x128xf32>
    %319 = arith.addf %313, %318 : vector<8x128xf32>
    %c0_192 = arith.constant 0 : index
    %c0_193 = arith.constant 0 : index
    %c208 = arith.constant 208 : index
    %320 = vector.load %arg2[%c0_192, %c0_193, %c208] : memref<1x4x352xf32, #tpu.memory_space<vmem>>, vector<1x4x128xf32>
    %321 = vector.shape_cast %320 : vector<1x4x128xf32> to vector<4x128xf32>
    %c11_194 = arith.constant 11 : index
    %c0_195 = arith.constant 0 : index
    %c0_196 = arith.constant 0 : index
    %322 = vector.load %arg3[%c11_194, %c0_195, %c0_196] : memref<13x8x4xf32, #tpu.memory_space<vmem>>, vector<1x8x4xf32>
    %323 = vector.shape_cast %322 : vector<1x8x4xf32> to vector<8x4xf32>
    %cst_197 = arith.constant dense<0.000000e+00> : vector<8x128xf32>
    %324 = tpu.matmul %323, %321, %cst_197 {dimension_numbers = #tpu.dot_dimension_numbers<[1], [0], [0], [1], [0, 0, 1, 1], [], []>} : vector<8x4xf32>, vector<4x128xf32>, vector<8x128xf32> -> vector<8x128xf32>
    %325 = arith.addf %319, %324 : vector<8x128xf32>
    %c0_198 = arith.constant 0 : index
    %c0_199 = arith.constant 0 : index
    %c224 = arith.constant 224 : index
    %326 = vector.load %arg2[%c0_198, %c0_199, %c224] : memref<1x4x352xf32, #tpu.memory_space<vmem>>, vector<1x4x128xf32>
    %327 = vector.shape_cast %326 : vector<1x4x128xf32> to vector<4x128xf32>
    %c12_200 = arith.constant 12 : index
    %c0_201 = arith.constant 0 : index
    %c0_202 = arith.constant 0 : index
    %328 = vector.load %arg3[%c12_200, %c0_201, %c0_202] : memref<13x8x4xf32, #tpu.memory_space<vmem>>, vector<1x8x4xf32>
    %329 = vector.shape_cast %328 : vector<1x8x4xf32> to vector<8x4xf32>
    %cst_203 = arith.constant dense<0.000000e+00> : vector<8x128xf32>
    %330 = tpu.matmul %329, %327, %cst_203 {dimension_numbers = #tpu.dot_dimension_numbers<[1], [0], [0], [1], [0, 0, 1, 1], [], []>} : vector<8x4xf32>, vector<4x128xf32>, vector<8x128xf32> -> vector<8x128xf32>
    %331 = arith.addf %325, %330 : vector<8x128xf32>
    %c0_204 = arith.constant 0 : index
    %c0_205 = arith.constant 0 : index
    %c128_206 = arith.constant 128 : index
    %332 = vector.load %arg6[%c0_204, %c0_205, %c128_206] : memref<1x8x256xf32, #tpu.memory_space<vmem>>, vector<1x8x128xf32>
    %333 = vector.shape_cast %332 : vector<1x8x128xf32> to vector<8x128xf32>
    %334 = vector.shape_cast %331 : vector<8x128xf32> to vector<1x8x128xf32>
    tpu.vector_store %arg6[%c0_204, %c0_205, %c128_206], %334 {strides = array<i32>} : memref<1x8x256xf32, #tpu.memory_space<vmem>>, vector<1x8x128xf32>,
    return
  }
  func.func @transform_0(%arg0: i32, %arg1: i32) -> (i32, i32, i32) {
    %c0_i32 = arith.constant 0 : i32
    %c0_i32_0 = arith.constant 0 : i32
    %c0_i32_1 = arith.constant 0 : i32
    return %arg0, %c0_i32, %c0_i32_0 : i32, i32, i32
  }
  func.func @transform_1(%arg0: i32, %arg1: i32) -> (i32, i32, i32) {
    %c0_i32 = arith.constant 0 : i32
    %c0_i32_0 = arith.constant 0 : i32
    %c0_i32_1 = arith.constant 0 : i32
    return %c0_i32, %arg1, %c0_i32_0 : i32, i32, i32
  }
  func.func @transform_2(%arg0: i32, %arg1: i32) -> (i32, i32) {
    %c0_i32 = arith.constant 0 : i32
    %c0_i32_0 = arith.constant 0 : i32
    %c0_i32_1 = arith.constant 0 : i32
    return %c0_i32, %c0_i32_0 : i32, i32
  }
  func.func @transform_3(%arg0: i32, %arg1: i32) -> (i32, i32) {
    %c0_i32 = arith.constant 0 : i32
    %c0_i32_0 = arith.constant 0 : i32
    return %arg1, %c0_i32 : i32, i32
  }
  func.func @transform_4(%arg0: i32, %arg1: i32) -> (i32, i32, i32) {
    %c0_i32 = arith.constant 0 : i32
    %c0_i32_0 = arith.constant 0 : i32
    return %arg0, %arg1, %c0_i32 : i32, i32, i32
  }
}

</mosaic_0001>

<bundles_post_ra>
// kernel: tpu_custom_call.1
= control target key start
LH: loop header
LB: loop body
LE: loop exit
PB: predicated region body
PF: predicated region fallthrough
CT: control target
= control target key end

     0   :  { %9 = vsyncpa [#allocation3], 0  ;;  %s3703_s0 = inlined_call_operand.vmem [shape: f32[2,4,352], index: 0, kind: input, shape index: {}]   ;;  %s3704_s1 = inlined_call_operand.vmem [shape: f32[13,8,4], index: 1, kind: input, shape index: {}]   ;;  %s3705_s2 = inlined_call_operand.vmem [shape: s32[1,256], index: 2, kind: input, shape index: {}]   ;;  %s3706_s3 = inlined_call_operand.vmem [shape: f32[8,1], index: 3, kind: input, shape index: {}]   ;;  %s3707_s4 = inlined_call_operand.hbm [shape: f32[2,8,256], index: 4, kind: output, shape index: {}]  }
   0x1   :  { %11 = vsyncpa [#allocation3 + $0x1], 0  ;;  %s3215_s15 = smov 0   ;;  %s3217_s16 = smov 0  }
   0x2   :  { %s3219_s17 = smov 0   ;;  %s3221_s18 = smov 0  }
   0x3   :  { %s3223_s19 = smov 0   ;;  %s3225_s20 = smov 0  }
   0x4 LB: > { %s2749_s21 = sadd.s32 4294967295, %s3172_s20   ;;  %s2750_s22 = sadd.s32 4294967294, %s3172_s20   ;;  %s3172_s20 = sphi %s3225_s20, %s17_s20   ;;  %s3168_s19 = sphi %s3223_s19, %s3730_s19   ;;  %s3164_s18 = sphi %s3221_s18, %s3729_s18   ;;  %s3160_s17 = sphi %s3219_s17, %s3728_s17   ;;  %s3156_s16 = sphi %s3217_s16, %s3727_s16   ;;  %s3152_s15 = sphi %s3215_s15, %s3726_s15  }
   0x5   : > { %s29_s23 = sadd.s32 1, %s3168_s19  ;;  %s137_s24 = sadd.s32 1, %s3160_s17 }
   0x6   : > { %p31_p0 = scmp.ge.s32.totalorder %s29_s23, 2  ;;  %p147_p1 = scmp.ne.s32.totalorder %s3160_s17, %s3156_s16 }
   0x7   : > { %p148_p2 = scmp.eq.s32.totalorder %s2749_s21, 1  ;;  %p153_p3 = scmp.ne.s32.totalorder %s3156_s16, %s3152_s15 }
   0x8   : > { %s3732_s23 = smov (%p31_p0, %s29_s23), 0  ;;  %p154_p5 = scmp.eq.s32.totalorder %s2750_s22, 1 }
   0x9   : > { %p3255_p4 = por %p148_p2, %p147_p1  ;;  %s132_s26 = ssub.s32 %s3168_s19, %s3732_s23 }
   0xa   : > { %p2755_p6 = scmp.ge.s32.totalorder %s3172_s20, 1  ;;  %p135_p7 = scmp.eq.s32.totalorder %s132_s26, 0 }
   0xb   : > { %p3262_p8 = por %p154_p5, %p153_p3  ;;  %p197_p9 = scmp.lt.s32.totalorder %s3172_s20, 3 }
   0xc   : > { %s3268_s28 = scalar_select %p135_p7, %s3160_s17, %s137_s24  }
   0xd   : > { %p198_p10 = pnand %p2755_p6, %p197_p9 }
   0xe   : > { %p231_p11 = scmp.lt.s32.totalorder (!%p198_p10), %s3164_s18, 1  ;;  %s3177_s8 = smov (!%p198_p10), 82  }
   0xf   : > { %201 = sbr.rel (%p198_p10) target bundleno = 443 (0x1bb), region = 36  ;;  %s3178_s9 = smov (!%p198_p10), 83  }
  0x10   : > { %s3179_s10 = smov (!%p198_p10), 81   ;;  %s3180_s11 = smov (!%p198_p10), 80  }
  0x11   : > { %s3181_s12 = smov (!%p198_p10), 79   ;;  %s3182_s13 = smov (!%p198_p10), 78  }
  0x12   : > { %s3183_s14 = smov (!%p198_p10), 77   ;;  %s3184_s21 = smov (!%p198_p10), 112  }
  0x13   : > { %s3185_s22 = smov (!%p198_p10), 96   ;;  %s3186_s24 = smov (!%p198_p10), 64  }
  0x14   : > { %v3174_v0 = vmov 0.0   ;;  %s232_s29 = scalar_select %p231_p11, %s3164_s18, 1  ;;  %v3175_v1 = vmov 0   ;;  %vm3176_vm0 = vmmov 0   ;;  %v252_v5 = vlaneseq  ;;  %v3313_v8 = vld [vmem:[%s3705_s2 + $0x1] sm:$0x1] }
  0x15   : > { %2897 = vmatprep.subr.mxu1 %v3174_v0  ;;  %2892 = vmatprep.subr.mxu0 %v3174_v0  ;;  %s3187_s26 = smov 48   ;;  %v1932_v9 = vadd.s32 2, %v3313_v8  ;;  %v2030_v12 = vadd.s32 3, %v3313_v8  ;;  %v244_v16 = vld [vmem:[%s3706_s3] sm:$0xff]  ;;  %v3373_v35 = vld [vmem:[%s3704_s1 + $0x8] sm:$0xff]  ;;  %v3412_v52 = vld [vmem:[%s3704_s1 + $0x18] sm:$0xff] }
  0x16   : > { %3093 = vset.pattern.permute.xlu0 %v3175_v1  ;;  %s3022_s30 = smul.u32 12, %s232_s29  ;;  %2894 = vmatprep.mubr.msk.f32.mxu0 %vm3176_vm0, %v3174_v0  ;;  %s3188_s29 = smov 32   ;;  %v253_v7 = vshrl.u32 %v252_v5, 7  ;;  %v245_v17 = vld [vmem:[%s3705_s2] sm:$0x1]  ;;  %v3421_v54 = vld [vmem:[%s3704_s1 + $0x10] sm:$0xff] }
  0x17   : > { %2899 = vmatprep.mubr.msk.f32.mxu1 %vm3176_vm0, %v3174_v0  ;;  %vm1933_vm1 = vcmp.ge.s32.totalorder %v1932_v9, 0  ;;  %vm1934_vm2 = vcmp.lt.s32.totalorder %v1932_v9, 16  ;;  %vm2031_vm4 = vcmp.ge.s32.totalorder %v2030_v12, 0  ;;  %vm2032_vm5 = vcmp.lt.s32.totalorder %v2030_v12, 16  ;;  %v3395_v45 = vld [vmem:[%s3704_s1] sm:$0xff]  ;;  %v3527_v38 = vld [vmem:[%s3704_s1 + $0x58] sm:$0xff] }
  0x18   : > { %s3278_s7 = scalar_lea.vmem %s3703_s0, %s3022_s30  ;;  %v3318_v10 = vsub.s32 0, %v253_v7  ;;  %vm1935_vm3 = vmand %vm1933_vm1, %vm1934_vm2  ;;  %v352_v18 = vadd.s32 4294967294, %v245_v17  ;;  %v247_v19 = vadd.s32 4294967293, %v245_v17  ;;  %v452_v20 = vadd.s32 4294967295, %v245_v17  ;;  %v3441_v60 = vld [vmem:[%s3704_s1 + $0x20] sm:$0xff] }
  0x19   : > { %v351_v2 = vld [vmem:[%s3278_s7] sm:$0xff]  ;;  %v3323_v11 = vsel %vm1935_vm3, 1, %v3175_v1  ;;  %vm2033_vm6 = vmand %vm2031_vm4, %vm2032_vm5  ;;  %v639_v22 = vadd.s32 1, %v245_v17  ;;  %vm368_vm1 = vcmask 670720   ;;  %v739_v28 = vadd.s32 2, %v245_v17 }
  0x1a   : > { %364 = vrot.lane.b32.xlu1 %v351_v2, %s3177_s8  ;;  %v363_v3 = vcombine.high %v351_v2, %v351_v2  ;;  %259 = vrot.lane.b32.xlu0 %v351_v2, %s3178_s9  ;;  %v1455_v4 = vld [vmem:[%s3278_s7 + $0x4] sm:$0xff]  ;;  %v1940_v13 = vrot.slane %v3323_v11, %v3318_v10  ;;  %v3331_v14 = vsel %vm2033_vm6, 1, %v3175_v1  ;;  %vm353_vm7 = vcmp.ge.s32.totalorder %v352_v18, 0 }
  0x1b   : > { %v1467_v6 = vcombine.high %v1455_v4, %v1455_v4  ;;  %v2038_v15 = vrot.slane %v3331_v14, %v3318_v10  ;;  %vm354_vm8 = vcmp.lt.s32.totalorder %v352_v18, 16  ;;  %vm248_vm10 = vcmp.ge.s32.totalorder %v247_v19, 0  ;;  %v3474_v18 = vld [vmem:[%s3704_s1 + $0x38] sm:$0xff] }
  0x1c   : > { %vm355_vm9 = vmand %vm353_vm7, %vm354_vm8  ;;  %vm249_vm11 = vcmp.lt.s32.totalorder %v247_v19, 16  ;;  %vm453_vm12 = vcmp.ge.s32.totalorder %v452_v20, 0  ;;  %vm454_vm13 = vcmp.lt.s32.totalorder %v452_v20, 16  ;;  %vm640_vm2 = vcmp.ge.s32.totalorder %v639_v22, 0 }
  0x1d   : > { %v356_v21 = vsel %vm355_vm9, 1, %v3175_v1  ;;  %vm250_vm14 = vmand %vm248_vm10, %vm249_vm11  ;;  %vm641_vm3 = vcmp.lt.s32.totalorder %v639_v22, 16  ;;  %vm277_vm5 = vcmask 1043456   ;;  %vm468_vm6 = vcmask 662528   ;;  %v3488_v22 = vld [vmem:[%s3704_s1 + $0x40] sm:$0xff] }
  0x1e   : > { %366 = vrot.lane.b32.xlu1 %v363_v3, %s3177_s8  ;;  %464 = vrot.lane.b32.xlu0 %v351_v2, %s3179_s10  ;;  %v360_v23 = vrot.slane %v356_v21, %v3318_v10  ;;  %vm455_vm15 = vmand %vm453_vm12, %vm454_vm13  ;;  %v251_v26 = vsel %vm250_vm14, 1, %v3175_v1  ;;  %vm263_vm7 = vcmask 678912   ;;  %vm273_vm8 = vcmask 31744  }
  0x1f   : > { %v456_v27 = vsel %vm455_vm15, 1, %v3175_v1  ;;  %v255_v30 = vrot.slane %v251_v26, %v3318_v10  ;;  %vm642_vm9 = vmand %vm640_vm2, %vm641_vm3  ;;  %vm740_vm10 = vcmp.ge.s32.totalorder %v739_v28, 0  ;;  %vm741_vm11 = vcmp.lt.s32.totalorder %v739_v28, 16  ;;  %v3500_v26 = vld [vmem:[%s3704_s1 + $0x48] sm:$0xff] }
  0x20   : > { %vm3363_vm4 = vcmp.eq.s32.totalorder %v360_v23, 1  ;;  %v460_v34 = vrot.slane %v456_v27, %v3318_v10  ;;  %v839_v37 = vadd.s32 3, %v245_v17  ;;  %v643_v41 = vsel %vm642_vm9, 1, %v3175_v1  ;;  %vm742_vm14 = vmand %vm740_vm10, %vm741_vm11 }
  0x21   : > { %vm3378_vm12 = vcmp.eq.s32.totalorder %v255_v30, 1  ;;  %vm560_vm15 = vcmask 654336   ;;  %v647_v47 = vrot.slane %v643_v41, %v3318_v10  ;;  %v743_v51 = vsel %vm742_vm14, 1, %v3175_v1 }
  0x22   : > { %466 = vrot.lane.b32.xlu1 %v363_v3, %s3179_s10  ;;  %261 = vrot.lane.b32.xlu0 %v363_v3, %s3178_s9  ;;  %vm3386_vm13 = vcmp.eq.s32.totalorder %v460_v34, 1  ;;  %vm840_vm2 = vcmp.ge.s32.totalorder %v839_v37, 0  ;;  %vm841_vm3 = vcmp.lt.s32.totalorder %v839_v37, 16  ;;  %vm655_vm9 = vcmask 646144  }
  0x23   : > { %vm648_vm10 = vcmp.eq.s32.totalorder %v647_v47, 1  ;;  %v747_v55 = vrot.slane %v743_v51, %v3318_v10  ;;  %vm3712_vm11 = vcmask 637952   ;;  %v1456_v23 = vadd.s32 4294967293, %v3313_v8 }
  0x24   : > { %v1553_v28 = vadd.s32 4294967294, %v3313_v8  ;;  %v1834_v47 = vadd.s32 1, %v3313_v8 }
  0x26   : > { %558 = vrot.lane.b32.xlu1 %v363_v3, %s3180_s11  ;;  %556 = vrot.lane.b32.xlu0 %v351_v2, %s3180_s11 }
  0x2a   : > { %653 = vrot.lane.b32.xlu1 %v363_v3, %s3181_s12  ;;  %651 = vrot.lane.b32.xlu0 %v351_v2, %s3181_s12 }
  0x2e   : > { %753 = vrot.lane.b32.xlu1 %v363_v3, %s3182_s13  ;;  %751 = vrot.lane.b32.xlu0 %v351_v2, %s3182_s13 }
  0x32   : > { %853 = vrot.lane.b32.xlu1 %v363_v3, %s3183_s14  ;;  %851 = vrot.lane.b32.xlu0 %v351_v2, %s3183_s14 }
  0x36   : > { %1025 = vrot.lane.b32.xlu1 %v363_v3, %s3184_s21  ;;  %1023 = vrot.lane.b32.xlu0 %v351_v2, %s3184_s21 }
  0x3a   : > { %1112 = vrot.lane.b32.xlu1 %v363_v3, %s3185_s22  ;;  %1110 = vrot.lane.b32.xlu0 %v351_v2, %s3185_s22 }
  0x3e   : > { %1199 = vrot.lane.b32.xlu1 %v363_v3, %s3186_s24  ;;  %1197 = vrot.lane.b32.xlu0 %v351_v2, %s3186_s24 }
  0x42   : > { %1286 = vrot.lane.b32.xlu1 %v363_v3, %s3187_s26  ;;  %1284 = vrot.lane.b32.xlu0 %v351_v2, %s3187_s26 }
  0x46   : > { %1373 = vrot.lane.b32.xlu1 %v363_v3, %s3188_s29  ;;  %1371 = vrot.lane.b32.xlu0 %v351_v2, %s3188_s29 }
  0x4a   : > { %1470 = vrot.lane.b32.xlu1 %v1467_v6, %s3178_s9  ;;  %1468 = vrot.lane.b32.xlu0 %v1455_v4, %s3178_s9  ;;  %s2839_s9 = sshll.u32 %s3164_s18, 8 }
  0x4e   : > { %1567 = vrot.lane.b32.xlu1 %v1467_v6, %s3177_s8  ;;  %1565 = vrot.lane.b32.xlu0 %v1455_v4, %s3177_s8 }
  0x52   : > { %1665 = vrot.lane.b32.xlu1 %v1467_v6, %s3179_s10  ;;  %1663 = vrot.lane.b32.xlu0 %v1455_v4, %s3179_s10 }
  0x56   : > { %1754 = vrot.lane.b32.xlu1 %v1467_v6, %s3180_s11  ;;  %1752 = vrot.lane.b32.xlu0 %v1455_v4, %s3180_s11 }
  0x5a   : > { %1848 = vrot.lane.b32.xlu1 %v1467_v6, %s3181_s12  ;;  %1846 = vrot.lane.b32.xlu0 %v1455_v4, %s3181_s12 }
  0x5e   : > { %1946 = vrot.lane.b32.xlu1 %v1467_v6, %s3182_s13  ;;  %1944 = vrot.lane.b32.xlu0 %v1455_v4, %s3182_s13  ;;  %s3660_s13 = scalar_lea.hbm %s3707_s4, %s2839_s9 }
  0x62   : > { %2044 = vrot.lane.b32.xlu1 %v1467_v6, %s3183_s14  ;;  %2042 = vrot.lane.b32.xlu0 %v1455_v4, %s3183_s14 }
  0x66   : > { %2212 = vrot.lane.b32.xlu1 %v1467_v6, %s3184_s21  ;;  %2210 = vrot.lane.b32.xlu0 %v1455_v4, %s3184_s21 }
  0x6a   : > { %2297 = vrot.lane.b32.xlu1 %v1467_v6, %s3185_s22  ;;  %2295 = vrot.lane.b32.xlu0 %v1455_v4, %s3185_s22  ;;  %s3189_s22 = smov [#allocation2]  }
  0x6b   : > { %s3100_s18 = sshll.u32 %s3189_s22, 4  ;;  %s3101_s18 = int_to_ptr.vmem [resolvable:$false] %s3100_s18 }
  0x6e   : > { %2382 = vrot.lane.b32.xlu1 %v1467_v6, %s3186_s24  ;;  %2380 = vrot.lane.b32.xlu0 %v1455_v4, %s3186_s24  ;;  %s3102_s24 = scalar_lea.vmem %s3101_s18, 512 }
  0x72   : > { %2467 = vrot.lane.b32.xlu1 %v1467_v6, %s3187_s26  ;;  %2465 = vrot.lane.b32.xlu0 %v1455_v4, %s3187_s26 }
  0x76   : > { %2552 = vrot.lane.b32.xlu1 %v1467_v6, %s3188_s29  ;;  %2550 = vrot.lane.b32.xlu0 %v1455_v4, %s3188_s29  ;;  %v3454_v4 = vld [vmem:[%s3704_s1 + $0x28] sm:$0xff]  ;;  %v938_v6 = vld [vmem:[%s3278_s7] sm:$0xf] }
  0x7a   : > { %270 = vperm.xlu0 %3093, %v244_v16   ;;  %v3465_v16 = vld [vmem:[%s3704_s1 + $0x30] sm:$0xff] }
  0x8c   : > { %v365_v24 = vpop.permute.xlu1 %364  ;;  %v260_v25 = vpop.permute.xlu0 %259 }
  0x90   : > { %v367_v31 = vpop.permute.xlu1 %366  ;;  %v465_v32 = vpop.permute.xlu0 %464 }
  0x91   : > { %v369_v33 = vsel %vm368_vm1, %v365_v24, %v367_v31  ;;  %v3513_v31 = vld [vmem:[%s3704_s1 + $0x50] sm:$0xff] }
  0x92   : > { %v371_v36 = vsel %vm3363_vm4, %v369_v33, 0.0  ;;  %vm842_vm4 = vmand %vm840_vm2, %vm841_vm3  ;;  %vm3709_vm2 = vcmask 916480   ;;  %vm3708_vm3 = vcmask 785408   ;;  %v1651_v33 = vadd.s32 4294967295, %v3313_v8 }
  0x93   : > { %2898 = vmatpush3.msk.msra.mxu1 %vm277_vm5, %v371_v36  ;;  %v843_v58 = vsel %vm842_vm4, 1, %v3175_v1  ;;  %vm3711_vm4 = vcmask 523264  }
  0x94   : > { %v467_v39 = vpop.permute.xlu1 %466  ;;  %v262_v40 = vpop.permute.xlu0 %261  ;;  %2907 = vmatprep.subr.mxu1 %v3174_v0  ;;  %2900 = vmatmul.mubr.msk.f32.vlgmr.msra.gmra.mxu1 %vm273_vm8, %v3373_v35  ;;  %v847_v62 = vrot.slane %v843_v58, %v3318_v10 }
  0x95   : > { %v469_v43 = vsel %vm468_vm6, %v465_v32, %v467_v39  ;;  %v264_v44 = vsel %vm263_vm7, %v260_v25, %v262_v40  ;;  %2909 = vmatprep.mubr.msk.f32.mxu1 %vm3176_vm0, %v3174_v0 }
  0x96   : > { %v266_v46 = vsel %vm3378_vm12, %v264_v44, 0.0  ;;  %v471_v48 = vsel %vm3386_vm13, %v469_v43, 0.0  ;;  %vm748_vm12 = vcmp.eq.s32.totalorder %v747_v55, 1  ;;  %vm3710_vm13 = vcmask 629760   ;;  %v3541_v44 = vld [vmem:[%s3704_s1 + $0x60] sm:$0xff] }
  0x97   : > { %2893 = vmatpush3.msk.msra.mxu0 %vm277_vm5, %v266_v46  ;;  %vm848_vm14 = vcmp.eq.s32.totalorder %v847_v62, 1 }
  0x98   : > { %v559_v49 = vpop.permute.xlu1 %558  ;;  %2902 = vmatprep.subr.mxu0 %v3174_v0  ;;  %v557_v50 = vpop.permute.xlu0 %556  ;;  %2895 = vmatmul.mubr.msk.f32.vlgmr.msra.gmra.mxu0 %vm273_vm8, %v3395_v45 }
  0x99   : > { %v561_v53 = vsel %vm560_vm15, %v557_v50, %v559_v49  ;;  %2903 = vmatpush3.msk.msra.mxu0 %vm277_vm5, %v471_v48  ;;  %2904 = vmatprep.mubr.msk.f32.mxu0 %vm3176_vm0, %v3174_v0 }
  0x9a   : > { %2908 = vmatpush3.msk.msra.mxu1 %vm277_vm5, %v561_v53  ;;  %2912 = vmatprep.subr.mxu0 %v3174_v0 }
  0x9b   : > { %2917 = vmatprep.subr.mxu1 %v3174_v0  ;;  %2910 = vmatmul.mubr.msk.f32.vlgmr.msra.gmra.mxu1 %vm273_vm8, %v3412_v52 }
  0x9c   : > { %v654_v56 = vpop.permute.xlu1 %653  ;;  %v652_v57 = vpop.permute.xlu0 %651  ;;  %2905 = vmatmul.mubr.msk.f32.vlgmr.msra.gmra.mxu0 %vm273_vm8, %v3421_v54  ;;  %2919 = vmatprep.mubr.msk.f32.mxu1 %vm3176_vm0, %v3174_v0 }
  0x9d   : > { %v656_v59 = vsel %vm655_vm9, %v652_v57, %v654_v56  ;;  %2914 = vmatprep.mubr.msk.f32.mxu0 %vm3176_vm0, %v3174_v0 }
  0x9e   : > { %v658_v61 = vsel %vm648_vm10, %v656_v59, 0.0  ;;  %vm1457_vm10 = vcmp.ge.s32.totalorder %v1456_v23, 0 }
  0x9f   : > { %2913 = vmatpush3.msk.msra.mxu0 %vm277_vm5, %v658_v61 }
  0xa0   : > { %v754_v63 = vpop.permute.xlu1 %753  ;;  %v752_v2 = vpop.permute.xlu0 %751  ;;  %2915 = vmatmul.mubr.msk.f32.vlgmr.msra.gmra.mxu0 %vm273_vm8, %v3441_v60  ;;  %2922 = vmatprep.subr.mxu0 %v3174_v0 }
  0xa1   : > { %v756_v3 = vsel %vm3712_vm11, %v752_v2, %v754_v63  ;;  %2924 = vmatprep.mubr.msk.f32.mxu0 %vm3176_vm0, %v3174_v0  ;;  %vm1653_vm11 = vcmp.lt.s32.totalorder %v1651_v33, 16 }
  0xa2   : > { %v758_v5 = vsel %vm748_vm12, %v756_v3, 0.0  ;;  %vm1458_vm12 = vcmp.lt.s32.totalorder %v1456_v23, 16 }
  0xa3   : > { %2918 = vmatpush3.msk.msra.mxu1 %vm277_vm5, %v758_v5 }
  0xa4   : > { %v854_v7 = vpop.permute.xlu1 %853  ;;  %v852_v9 = vpop.permute.xlu0 %851  ;;  %2920 = vmatmul.mubr.msk.f32.vlgmr.msra.gmra.mxu1 %vm273_vm8, %v3454_v4  ;;  %2927 = vmatprep.subr.mxu1 %v3174_v0 }
  0xa5   : > { %v856_v12 = vsel %vm3710_vm13, %v852_v9, %v854_v7  ;;  %2928 = vmatpush3.msk.msra.mxu1 %vm277_vm5, %v938_v6  ;;  %2929 = vmatprep.mubr.msk.f32.mxu1 %vm3176_vm0, %v3174_v0  ;;  %vm1555_vm13 = vcmp.lt.s32.totalorder %v1553_v28, 16 }
  0xa6   : > { %v858_v17 = vsel %vm848_vm14, %v856_v12, 0.0  ;;  %2937 = vmatprep.subr.mxu1 %v3174_v0  ;;  %vm1459_vm14 = vmand %vm1457_vm10, %vm1458_vm12  ;;  %vm1375_vm12 = vcmask 261120  }
  0xa7   : > { %2923 = vmatpush3.msk.msra.mxu0 %vm277_vm5, %v858_v17  ;;  %v1460_v37 = vsel %vm1459_vm14, 1, %v3175_v1 }
  0xa8   : > { %v1026_v19 = vpop.permute.xlu1 %1025  ;;  %v1024_v20 = vpop.permute.xlu0 %1023  ;;  %2932 = vmatprep.subr.mxu0 %v3174_v0  ;;  %2925 = vmatmul.mubr.msk.f32.vlgmr.msra.gmra.mxu0 %vm273_vm8, %v3465_v16  ;;  %v1464_v40 = vrot.slane %v1460_v37, %v3318_v10 }
  0xa9   : > { %v1028_v21 = vsel %vm3709_vm2, %v1024_v20, %v1026_v19  ;;  %2930 = vmatmul.mubr.msk.f32.vlgmr.msra.gmra.mxu1 %vm273_vm8, %v3474_v18  ;;  %2934 = vmatprep.mubr.msk.f32.mxu0 %vm3176_vm0, %v3174_v0  ;;  %vm1554_vm2 = vcmp.ge.s32.totalorder %v1553_v28, 0  ;;  %v2127_v20 = vld [vmem:[%s3278_s7 + $0x4] sm:$0xf]  ;;  %s228_s7 = sand.u32 1, %s3156_s16  }
  0xaa   : > { %2933 = vmatpush3.msk.msra.mxu0 %vm277_vm5, %v1028_v21  ;;  %2939 = vmatprep.mubr.msk.f32.mxu1 %vm3176_vm0, %v3174_v0  ;;  %vm1556_vm10 = vmand %vm1554_vm2, %vm1555_vm13  ;;  %vm1465_vm2 = vcmp.eq.s32.totalorder %v1464_v40, 1  ;;  %s2756_s6 = sshll.u32 %s228_s7, 4  ;;  %s2633_s14 = scalar_lea.sflag [#allocation3], %s228_s7 }
  0xab   : > { %2942 = vmatprep.subr.mxu0 %v3174_v0  ;;  %v1557_v43 = vsel %vm1556_vm10, 1, %v3175_v1  ;;  %s3652_s8 = scalar_lea.vmem [#allocation2], %s2756_s6 }
  0xac   : > { %v1113_v24 = vpop.permute.xlu1 %1112  ;;  %v1111_v25 = vpop.permute.xlu0 %1110  ;;  %2935 = vmatmul.mubr.msk.f32.vlgmr.msra.gmra.mxu0 %vm273_vm8, %v3488_v22  ;;  %v1561_v48 = vrot.slane %v1557_v43, %v3318_v10  ;;  %s2649_s10 = sshll.u32 %s3652_s8, 4  ;;  %s2650_s10 = int_to_ptr.vmem [resolvable:$true] %s2649_s10 }
  0xad   : > { %v1115_v27 = vsel %vm3708_vm3, %v1111_v25, %v1113_v24  ;;  %2944 = vmatprep.mubr.msk.f32.mxu0 %vm3176_vm0, %v3174_v0  ;;  %vm1288_vm3 = vcmask 392192   ;;  %s3096_s21 = scalar_lea.vmem %s2650_s10, 256  ;;  %p3103_p1 = scmp.lt.s32.totalorder %s2650_s10, %s3101_s18 }
  0xae   : > { %2938 = vmatpush3.msk.msra.mxu1 %vm277_vm5, %v1115_v27  ;;  %vm1562_vm14 = vcmp.eq.s32.totalorder %v1561_v48, 1  ;;  %p3097_p12 = scmp.ne.s32.totalorder %s2650_s10, %s3096_s21  ;;  %p3104_p2 = scmp.lt.s32.totalorder %s3102_s24, %s3096_s21 }
  0xaf   : > { %2947 = vmatprep.subr.mxu1 %v3174_v0  ;;  %2940 = vmatmul.mubr.msk.f32.vlgmr.msra.gmra.mxu1 %vm273_vm8, %v3500_v26 }
  0xb0   : > { %v1200_v29 = vpop.permute.xlu1 %1199  ;;  %v1198_v30 = vpop.permute.xlu0 %1197  ;;  %2949 = vmatprep.mubr.msk.f32.mxu1 %vm3176_vm0, %v3174_v0  ;;  %p3098_p13 = pnand %p3097_p12, %p3255_p4  ;;  %p3105_p3 = por %p3104_p2, %p3103_p1 }
  0xb1   : > { %v1202_v32 = vsel %vm3711_vm4, %v1198_v30, %v1200_v29  ;;  %vm1652_vm4 = vcmp.ge.s32.totalorder %v1651_v33, 0 }
  0xb2   : > { %2943 = vmatpush3.msk.msra.mxu0 %vm277_vm5, %v1202_v32  ;;  %vm1654_vm13 = vmand %vm1652_vm4, %vm1653_vm11  ;;  %vm1835_vm11 = vcmp.ge.s32.totalorder %v1834_v47, 0  ;;  %vm1836_vm4 = vcmp.lt.s32.totalorder %v1834_v47, 16  ;;  %p3099_p0 = pneg %p3098_p13 }
  0xb3   : > { %2952 = vmatprep.subr.mxu0 %v3174_v0  ;;  %2945 = vmatmul.mubr.msk.f32.vlgmr.msra.gmra.mxu0 %vm273_vm8, %v3513_v31  ;;  %v1655_v51 = vsel %vm1654_vm13, 1, %v3175_v1  ;;  %vm1837_vm10 = vmand %vm1835_vm11, %vm1836_vm4  ;;  %vm3722_vm13 = vcmask 629760   ;;  %vm3724_vm11 = vcmask 785408   ;;  %vm3725_vm4 = vcmask 523264  }
  0xb4   : > { %v1287_v34 = vpop.permute.xlu1 %1286  ;;  %v1285_v36 = vpop.permute.xlu0 %1284  ;;  %2954 = vmatprep.mubr.msk.f32.mxu0 %vm3176_vm0, %v3174_v0  ;;  %v1659_v8 = vrot.slane %v1655_v51, %v3318_v10  ;;  %v1838_v63 = vsel %vm1837_vm10, 1, %v3175_v1  ;;  %p3106_p5 = pnand %p3105_p3, %p3099_p0 }
  0xb5   : > { %v1289_v39 = vsel %vm1288_vm3, %v1285_v36, %v1287_v34  ;;  %v1842_v3 = vrot.slane %v1838_v63, %v3318_v10 }
  0xb6   : > { %2948 = vmatpush3.msk.msra.mxu1 %vm277_vm5, %v1289_v39 }
  0xb7   : > { %2957 = vmatprep.subr.mxu1 %v3174_v0  ;;  %2950 = vmatmul.mubr.msk.f32.vlgmr.msra.gmra.mxu1 %vm273_vm8, %v3527_v38 }
  0xb8   : > { %v1374_v41 = vpop.permute.xlu1 %1373  ;;  %v1372_v42 = vpop.permute.xlu0 %1371  ;;  %2959 = vmatprep.mubr.msk.f32.mxu1 %vm3176_vm0, %v3174_v0 }
  0xb9   : > { %v1376_v46 = vsel %vm1375_vm12, %v1372_v42, %v1374_v41 }
  0xba   : > { %2953 = vmatpush3.msk.msra.mxu0 %vm277_vm5, %v1376_v46 }
  0xbb   : > { %2962 = vmatprep.subr.mxu0 %v3174_v0  ;;  %2955 = vmatmul.mubr.msk.f32.vlgmr.msra.gmra.mxu0 %vm273_vm8, %v3541_v44 }
  0xbc   : > { %v1471_v49 = vpop.permute.xlu1 %1470  ;;  %v1469_v50 = vpop.permute.xlu0 %1468  ;;  %2964 = vmatprep.mubr.msk.f32.mxu0 %vm3176_vm0, %v3174_v0 }
  0xbd   : > { %v1472_v53 = vsel %vm263_vm7, %v1469_v50, %v1471_v49  ;;  %vm1660_vm7 = vcmp.eq.s32.totalorder %v1659_v8, 1 }
  0xbe   : > { %v1474_v55 = vsel %vm1465_vm2, %v1472_v53, 0.0  ;;  %vm3723_vm2 = vcmask 916480  }
  0xbf   : > { %2958 = vmatpush3.msk.msra.mxu1 %vm277_vm5, %v1474_v55 }
  0xc0   : > { %v1568_v56 = vpop.permute.xlu1 %1567  ;;  %v1566_v57 = vpop.permute.xlu0 %1565  ;;  %2967 = vmatprep.subr.mxu1 %v3174_v0  ;;  %2960 = vmatmul.mubr.msk.f32.vlgmr.msra.gmra.mxu1 %vm273_vm8, %v3395_v45 }
  0xc1   : > { %v1569_v58 = vsel %vm368_vm1, %v1566_v57, %v1568_v56  ;;  %2969 = vmatprep.mubr.msk.f32.mxu1 %vm3176_vm0, %v3174_v0  ;;  %vm1843_vm1 = vcmp.eq.s32.totalorder %v1842_v3, 1 }
  0xc2   : > { %v1571_v59 = vsel %vm1562_vm14, %v1569_v58, 0.0 }
  0xc3   : > { %2963 = vmatpush3.msk.msra.mxu0 %vm277_vm5, %v1571_v59 }
  0xc4   : > { %v1666_v61 = vpop.permute.xlu1 %1665  ;;  %v1664_v62 = vpop.permute.xlu0 %1663  ;;  %2972 = vmatprep.subr.mxu0 %v3174_v0  ;;  %2965 = vmatmul.mubr.msk.f32.vlgmr.msra.gmra.mxu0 %vm273_vm8, %v3373_v35 }
  0xc5   : > { %v1667_v45 = vsel %vm468_vm6, %v1664_v62, %v1666_v61  ;;  %2974 = vmatprep.mubr.msk.f32.mxu0 %vm3176_vm0, %v3174_v0  ;;  %vm1941_vm6 = vcmp.eq.s32.totalorder %v1940_v13, 1 }
  0xc6   : > { %v1669_v2 = vsel %vm1660_vm7, %v1667_v45, 0.0 }
  0xc7   : > { %2968 = vmatpush3.msk.msra.mxu1 %vm277_vm5, %v1669_v2 }
  0xc8   : > { %v1755_v5 = vpop.permute.xlu1 %1754  ;;  %v1753_v6 = vpop.permute.xlu0 %1752  ;;  %2977 = vmatprep.subr.mxu1 %v3174_v0  ;;  %2970 = vmatmul.mubr.msk.f32.vlgmr.msra.gmra.mxu1 %vm273_vm8, %v3421_v54 }
  0xc9   : > { %v1756_v35 = vsel %vm560_vm15, %v1753_v6, %v1755_v5  ;;  %2979 = vmatprep.mubr.msk.f32.mxu1 %vm3176_vm0, %v3174_v0  ;;  %vm3721_vm15 = vcmask 637952  }
  0xca   : > { %2973 = vmatpush3.msk.msra.mxu0 %vm277_vm5, %v1756_v35 }
  0xcb   : > { %2982 = vmatprep.subr.mxu0 %v3174_v0  ;;  %2975 = vmatmul.mubr.msk.f32.vlgmr.msra.gmra.mxu0 %vm273_vm8, %v3412_v52 }
  0xcc   : > { %v1849_v1 = vpop.permute.xlu1 %1848  ;;  %v1847_v7 = vpop.permute.xlu0 %1846  ;;  %2984 = vmatprep.mubr.msk.f32.mxu0 %vm3176_vm0, %v3174_v0 }
  0xcd   : > { %v1850_v54 = vsel %vm655_vm9, %v1847_v7, %v1849_v1  ;;  %vm2039_vm9 = vcmp.eq.s32.totalorder %v2038_v15, 1 }
  0xce   : > { %v1852_v9 = vsel %vm1843_vm1, %v1850_v54, 0.0 }
  0xcf   : > { %2978 = vmatpush3.msk.msra.mxu1 %vm277_vm5, %v1852_v9 }
  0xd0   : > { %v1947_v12 = vpop.permute.xlu1 %1946  ;;  %v1945_v17 = vpop.permute.xlu0 %1944  ;;  %2980 = vmatmul.mubr.msk.f32.vlgmr.msra.gmra.mxu1 %vm273_vm8, %v3441_v60  ;;  %2987 = vmatprep.subr.mxu1 %v3174_v0 }
  0xd1   : > { %v1948_v52 = vsel %vm3721_vm15, %v1945_v17, %v1947_v12  ;;  %2989 = vmatprep.mubr.msk.f32.mxu1 %vm3176_vm0, %v3174_v0 }
  0xd2   : > { %v1950_v19 = vsel %vm1941_vm6, %v1948_v52, 0.0 }
  0xd3   : > { %2983 = vmatpush3.msk.msra.mxu0 %vm277_vm5, %v1950_v19 }
  0xd4   : > { %v2045_v11 = vpop.permute.xlu1 %2044  ;;  %v2043_v13 = vpop.permute.xlu0 %2042  ;;  %2985 = vmatmul.mubr.msk.f32.vlgmr.msra.gmra.mxu0 %vm273_vm8, %v3454_v4  ;;  %2992 = vmatprep.subr.mxu0 %v3174_v0 }
  0xd5   : > { %v2046_v60 = vsel %vm3722_vm13, %v2043_v13, %v2045_v11  ;;  %2993 = vmatpush3.msk.msra.mxu0 %vm277_vm5, %v2127_v20  ;;  %2994 = vmatprep.mubr.msk.f32.mxu0 %vm3176_vm0, %v3174_v0 }
  0xd6   : > { %v2048_v21 = vsel %vm2039_vm9, %v2046_v60, 0.0  ;;  %3002 = vmatprep.subr.mxu0 %v3174_v0 }
  0xd7   : > { %2988 = vmatpush3.msk.msra.mxu1 %vm277_vm5, %v2048_v21 }
  0xd8   : > { %v2213_v10 = vpop.permute.xlu1 %2212  ;;  %v2211_v14 = vpop.permute.xlu0 %2210  ;;  %2997 = vmatprep.subr.mxu1 %v3174_v0  ;;  %2990 = vmatmul.mubr.msk.f32.vlgmr.msra.gmra.mxu1 %vm273_vm8, %v3465_v16 }
  0xd9   : > { %v2214_v15 = vsel %vm3723_vm2, %v2211_v14, %v2213_v10  ;;  %2995 = vmatmul.mubr.msk.f32.vlgmr.msra.gmra.mxu0 %vm273_vm8, %v3474_v18  ;;  %2999 = vmatprep.mubr.msk.f32.mxu1 %vm3176_vm0, %v3174_v0 }
  0xda   : > { %2998 = vmatpush3.msk.msra.mxu1 %vm277_vm5, %v2214_v15  ;;  %3004 = vmatprep.mubr.msk.f32.mxu0 %vm3176_vm0, %v3174_v0 }
  0xdb   : > { %3007 = vmatprep.subr.mxu1 %v3174_v0 }
  0xdc   : > { %v2298_v4 = vpop.permute.xlu1 %2297  ;;  %v2296_v23 = vpop.permute.xlu0 %2295  ;;  %3000 = vmatmul.mubr.msk.f32.vlgmr.msra.gmra.mxu1 %vm273_vm8, %v3488_v22 }
  0xdd   : > { %v2299_v16 = vsel %vm3724_vm11, %v2296_v23, %v2298_v4  ;;  %3009 = vmatprep.mubr.msk.f32.mxu1 %vm3176_vm0, %v3174_v0 }
  0xde   : > { %3003 = vmatpush3.msk.msra.mxu0 %vm277_vm5, %v2299_v16 }
  0xdf   : > { %3012 = vmatprep.subr.mxu0 %v3174_v0  ;;  %3005 = vmatmul.mubr.msk.f32.vlgmr.msra.gmra.mxu0 %vm273_vm8, %v3500_v26 }
  0xe0   : > { %v2383_v18 = vpop.permute.xlu1 %2382  ;;  %v2381_v24 = vpop.permute.xlu0 %2380  ;;  %3014 = vmatprep.mubr.msk.f32.mxu0 %vm3176_vm0, %v3174_v0 }
  0xe1   : > { %v2384_v25 = vsel %vm3725_vm4, %v2381_v24, %v2383_v18 }
  0xe2   : > { %3008 = vmatpush3.msk.msra.mxu1 %vm277_vm5, %v2384_v25 }
  0xe3   : > { %3010 = vmatmul.mubr.msk.f32.vlgmr.msra.gmra.mxu1 %vm273_vm8, %v3513_v31  ;;  %3017 = vmatprep.subr.mxu1 %v3174_v0 }
  0xe4   : > { %v2468_v22 = vpop.permute.xlu1 %2467  ;;  %v2466_v27 = vpop.permute.xlu0 %2465  ;;  %3019 = vmatprep.mubr.msk.f32.mxu1 %vm3176_vm0, %v3174_v0 }
  0xe5   : > { %v2469_v26 = vsel %vm1288_vm3, %v2466_v27, %v2468_v22 }
  0xe6   : > { %3013 = vmatpush3.msk.msra.mxu0 %vm277_vm5, %v2469_v26 }
  0xe7   : > { %3015 = vmatmul.mubr.msk.f32.vlgmr.msra.gmra.mxu0 %vm273_vm8, %v3527_v38 }
  0xe8   : > { %v2553_v28 = vpop.permute.xlu1 %2552  ;;  %v2551_v29 = vpop.permute.xlu0 %2550 }
  0xe9   : > { %v2554_v30 = vsel %vm1375_vm12, %v2551_v29, %v2553_v28 }
  0xea   : > { %3018 = vmatpush3.msk.msra.mxu1 %vm277_vm5, %v2554_v30 }
  0xeb   : > { %3020 = vmatmul.mubr.msk.f32.vlgmr.msra.gmra.mxu1 %vm273_vm8, %v3541_v44 }
  0xf5   : > { %v271_v32 = vpop.permute.xlu0 %270 }
 0x154   : > { %v446_v31 = vpop.f32.mrf.mxu1 }
 0x156   : > { %v2901_v33 = vpop.f32.mrf.mxu1 }
 0x158   : > { %v347_v0 = vpop.f32.mrf.mxu0 }
 0x159   : > { %v348_v34 = vadd.f32 %v347_v0, %v271_v32 }
 0x15a   : > { %v2896_v36 = vpop.f32.mrf.mxu0 }
 0x15b   : > { %v450_v37 = vadd.f32 %v446_v31, %v348_v34  ;;  %v633_v39 = vpop.f32.mrf.mxu1 }
 0x15c   : > { %v546_v40 = vpop.f32.mrf.mxu0 }
 0x15d   : > { %v550_v41 = vadd.f32 %v546_v40, %v450_v37  ;;  %v2911_v38 = vpop.f32.mrf.mxu1 }
 0x15e   : > { %v2906_v42 = vpop.f32.mrf.mxu0 }
 0x15f   : > { %v637_v43 = vadd.f32 %v633_v39, %v550_v41 }
 0x160   : > { %v733_v46 = vpop.f32.mrf.mxu0 }
 0x161   : > { %v737_v47 = vadd.f32 %v733_v46, %v637_v43 }
 0x162   : > { %v2916_v48 = vpop.f32.mrf.mxu0 }
 0x164   : > { %v833_v49 = vpop.f32.mrf.mxu1 }
 0x165   : > { %v837_v50 = vadd.f32 %v833_v49, %v737_v47 }
 0x166   : > { %v2921_v51 = vpop.f32.mrf.mxu1 }
 0x168   : > { %v933_v44 = vpop.f32.mrf.mxu0 }
 0x169   : > { %v937_v53 = vadd.f32 %v933_v44, %v837_v50  ;;  %v1013_v55 = vpop.f32.mrf.mxu1 }
 0x16a   : > { %v2926_v8 = vpop.f32.mrf.mxu0 }
 0x16b   : > { %v1017_v56 = vadd.f32 %v1013_v55, %v937_v53  ;;  %v2931_v57 = vpop.f32.mrf.mxu1 }
 0x16c   : > { %v1100_v58 = vpop.f32.mrf.mxu0 }
 0x16d   : > { %v1104_v59 = vadd.f32 %v1100_v58, %v1017_v56 }
 0x16e   : > { %v2936_v61 = vpop.f32.mrf.mxu0 }
 0x16f   : > { %v1187_v62 = vpop.f32.mrf.mxu1 }
 0x170   : > { %v1191_v63 = vadd.f32 %v1187_v62, %v1104_v59 }
 0x171   : > { %v2941_v45 = vpop.f32.mrf.mxu1 }
 0x173   : > { %v1274_v2 = vpop.f32.mrf.mxu0 }
 0x174   : > { %v1278_v3 = vadd.f32 %v1274_v2, %v1191_v63 }
 0x175   : > { %v2946_v5 = vpop.f32.mrf.mxu0 }
 0x177   : > { %v1361_v6 = vpop.f32.mrf.mxu1 }
 0x178   : > { %v1365_v35 = vadd.f32 %v1361_v6, %v1278_v3 }
 0x179   : > { %v2951_v1 = vpop.f32.mrf.mxu1 }
 0x17b   : > { %v1448_v7 = vpop.f32.mrf.mxu0 }
 0x17c   : > { %v1452_v54 = vadd.f32 %v1448_v7, %v1365_v35 }
 0x17d   : > { %v2956_v9 = vpop.f32.mrf.mxu0 }
 0x17e   : > { %1453 = vst [vmem:[%s3652_s8] sm:$0xff] %v1452_v54 }
 0x180   : > { %v1548_v12 = vpop.f32.mrf.mxu1 }
 0x181   : > { %v1549_v17 = vadd.f32 %v1548_v12, %v271_v32 }
 0x182   : > { %v2961_v52 = vpop.f32.mrf.mxu1 }
 0x184   : > { %v1645_v19 = vpop.f32.mrf.mxu0 }
 0x185   : > { %v1649_v20 = vadd.f32 %v1645_v19, %v1549_v17 }
 0x186   : > { %v2966_v11 = vpop.f32.mrf.mxu0 }
 0x188   : > { %v1743_v13 = vpop.f32.mrf.mxu1 }
 0x189   : > { %v1747_v60 = vadd.f32 %v1743_v13, %v1649_v20 }
 0x18a   : > { %v2971_v21 = vpop.f32.mrf.mxu1 }
 0x18b   : > { %v1828_v10 = vpop.f32.mrf.mxu0 }
 0x18c   : > { %v1832_v14 = vadd.f32 %v1828_v10, %v1747_v60 }
 0x18d   : > { %v2976_v15 = vpop.f32.mrf.mxu0 }
 0x190   : > { %v1926_v4 = vpop.f32.mrf.mxu1 }
 0x191   : > { %v1930_v23 = vadd.f32 %v1926_v4, %v1832_v14 }
 0x192   : > { %v2981_v16 = vpop.f32.mrf.mxu1 }
 0x194   : > { %v2024_v18 = vpop.f32.mrf.mxu0 }
 0x195   : > { %v2028_v24 = vadd.f32 %v2024_v18, %v1930_v23 }
 0x196   : > { %v2986_v25 = vpop.f32.mrf.mxu0 }
 0x198   : > { %v2122_v22 = vpop.f32.mrf.mxu1 }
 0x199   : > { %v2126_v27 = vadd.f32 %v2122_v22, %v2028_v24  ;;  %v2201_v26 = vpop.f32.mrf.mxu0 }
 0x19a   : > { %v2991_v28 = vpop.f32.mrf.mxu1 }
 0x19b   : > { %v2205_v29 = vadd.f32 %v2201_v26, %v2126_v27  ;;  %v2996_v30 = vpop.f32.mrf.mxu0 }
 0x19c   : > { %v2286_v31 = vpop.f32.mrf.mxu1 }
 0x19d   : > { %v2290_v32 = vadd.f32 %v2286_v31, %v2205_v29 }
 0x19e   : > { %v3001_v33 = vpop.f32.mrf.mxu1 }
 0x19f   : > { %v2371_v0 = vpop.f32.mrf.mxu0 }
 0x1a0   : > { %v2375_v34 = vadd.f32 %v2371_v0, %v2290_v32 }
 0x1a1   : > { %v3006_v36 = vpop.f32.mrf.mxu0 }
 0x1a3   : > { %v2456_v37 = vpop.f32.mrf.mxu1 }
 0x1a4   : > { %v2460_v39 = vadd.f32 %v2456_v37, %v2375_v34 }
 0x1a5   : > { %v3011_v40 = vpop.f32.mrf.mxu1 }
 0x1a7   : > { %v2541_v41 = vpop.f32.mrf.mxu0 }
 0x1a8   : > { %v2545_v38 = vadd.f32 %v2541_v41, %v2460_v39 }
 0x1a9   : > { %v3016_v42 = vpop.f32.mrf.mxu0 }
 0x1ab   : > { %v2626_v43 = vpop.f32.mrf.mxu1 }
 0x1ac   : > { %v2630_v46 = vadd.f32 %v2626_v43, %v2545_v38 }
 0x1ad   : > { %v3021_v47 = vpop.f32.mrf.mxu1 }
 0x1ae   : > { %2631 = vst [vmem:[%s3652_s8 + $0x8] sm:$0xff] %v2630_v46 }
 0x1af   : > { %3109 = shalt.err (!%p3106_p5)
}
 0x1b0   : > { %s3110_s26 = scalar_lea.hbm %s3660_s13, 256  ;;  %s3114_s5 = scalar_lea.hbm %s3707_s4, 512 }
 0x1b1   : > { %p3111_p6 = scmp.ne.s32.totalorder %s3660_s13, %s3110_s26  ;;  %p3115_p10 = scmp.lt.s32.totalorder %s3660_s13, %s3707_s4 }
 0x1b2   : > { %p3116_p11 = scmp.lt.s32.totalorder %s3114_s5, %s3110_s26 }
 0x1b3   : > { %p3112_p7 = pnand %p3111_p6, %p3255_p4 }
 0x1b4   : > { %p3117_p12 = por %p3116_p11, %p3115_p10 }
 0x1b5   : > { %p3113_p9 = pneg %p3112_p7 }
 0x1b7   : > { %p3118_p13 = pnand %p3117_p12, %p3113_p9 }
 0x1b9   : > { %3121 = shalt.err (!%p3118_p13)
}
 0x1ba   : > { %3023 = dma.vmem_to_hbm [thread:$0]  (%p3255_p4), %s2650_s10, 256, %s3660_s13, %s2633_s14  }
 0x1bb PF: > { %p3029_p0 = scmp.ge.s32.totalorder %s3172_s20, 2  ;;  %s2661_s8 = sand.u32 1, %s3152_s15  }
 0x1bc   : > { %s2662_s9 = scalar_lea.sflag [#allocation3], %s2661_s8 }
 0x1bd   : > { %p3026_p1 = pnand %p3029_p0, %p3262_p8 }
 0x1bf   : > { %p3027_p2 = pneg %p3026_p1 }
 0x1c1   : > { %3147 = dma.done.wait (%p3027_p2), %s2662_s9, 256  }
 0x1c2   : > { %3149 = vsyncadd (%p3027_p2), %s2662_s9, 4294967040  ;;  %s17_s20 = sadd.s32 1, %s3172_s20   ;;  %s3726_s15 = smov %s3156_s16 }
 0x1c3   : > { %p14_p3 = scmp.ge.s32.totalorder %s17_s20, 4   ;;  %s3727_s16 = smov %s3160_s17 }
 0x1c4   : > { %s3728_s17 = smov %s3268_s28  ;;  %s3729_s18 = smov %s3168_s19 }
 0x1c5   : > { %s3730_s19 = smov %s3732_s23  ;;  %16 = sbr.rel (!%p14_p3) target bundleno = 4 (0x4), region = 89 }
 0x1ca   :  { %2667 = vsyncpa [#allocation3], 1 }
 0x1cb   :  { %2669 = vsyncpa [#allocation3 + $0x1], 1 }

</bundles_post_ra>
